<compile_context>
chip_gen: v6e
topology: v6e:2x2x1
jax: 0.10.0
libtpu: 0.0.40
codegen_flags: <defaults>
</compile_context>

<pallas_src>
import math
import jax
import jax.numpy as jnp
from jax.experimental import pallas as pl
from jax.experimental.pallas import tpu as pltpu

# ----------------------------- config ---------------------------------------
B = 2               # batch
S = 8               # sequence length
T = B * S           # folded batch*seq
INPUT_SIZE = 16     # config['input_size']
HIDDEN = 32         # config['hidden_size']
N_HEADS = 4
HEAD_DIM = HIDDEN // N_HEADS
INTERMEDIATE = 4 * HIDDEN
N_BLOCKS = 2        # config['n_blocks']
LN_EPS = 1e-12

# misc slab row layout (lane width = HIDDEN)
_MISC_PROJ_W = 0                            # rows [0,16)  : input_projection W (16,32)
_MISC_POOL_W = _MISC_PROJ_W + INPUT_SIZE    # rows [16,48) : pooler W (32,32)
_MISC_PE     = _MISC_POOL_W + HIDDEN        # rows [48,56) : positional encoding (8,32)
_MISC_PROJ_B = _MISC_PE + S                 # row 56       : input_projection bias
_MISC_POOL_B = _MISC_PROJ_B + 1             # row 57       : pooler bias
_MISC_MASK   = _MISC_POOL_B + 1             # rows [58,74) : block-diag attn mask (lanes 0:T)
_MISC_ROWS   = _MISC_MASK + T


# ----------------------------- helpers --------------------------------------
def _full_spec(shape):
    nd = len(shape)
    return pl.BlockSpec(shape, lambda i, nd=nd: (0,) * nd)


def _recip(x):
    # 1/x on the EUP (approx) + one Newton-Raphson step (~1e-7 rel err).
    r = pl.reciprocal(x, approx=True)
    return r * (2.0 - x * r)


def _layernorm(x, gamma, beta):
    mu = jnp.mean(x, axis=-1, keepdims=True)
    var = jnp.mean((x - mu) ** 2, axis=-1, keepdims=True)
    return (x - mu) * jax.lax.rsqrt(var + LN_EPS) * gamma + beta


def _erf(x):
    # Abramowitz & Stegun 7.1.26 rational approximation, max abs err ~1.5e-7.
    # Uses only exp / mul / add + EUP reciprocal (no lax.erf lowering needed).
    a1, a2, a3, a4, a5 = 0.254829592, -0.284496736, 1.421413741, -1.453152027, 1.061405429
    p = 0.3275911
    sgn = jnp.where(x >= 0.0, 1.0, -1.0)
    ax = jnp.abs(x)
    t = _recip(1.0 + p * ax)
    poly = ((((a5 * t + a4) * t + a3) * t + a2) * t + a1) * t
    return sgn * (1.0 - poly * jnp.exp(-ax * ax))


def _gelu_exact(x):
    return 0.5 * x * (1.0 + _erf(x * (1.0 / math.sqrt(2.0))))


# ----------------------------- fused kernel ---------------------------------
def fused_kernel(x_ref, misc_ref, wa_ref, w2_ref, vec_ref, o_ref):
    # x_ref    (T, INPUT_SIZE)
    # misc_ref (_MISC_ROWS, H): proj_w / pool_w / pe / proj_b / pool_b / attn mask
    # wa_ref   (N_BLOCKS, 2H, 4H): rows[0:H]  = [Wq|Wk|Wv|Wo] (lanes 0:3H qkv, 3H:4H wo)
    #                              rows[H:2H] = W1 (H, 4H)
    # w2_ref   (N_BLOCKS, 4H, H): W2
    # vec_ref  (N_BLOCKS, 8, 4H): row0 b_qkv(0:3H) row1 bo row2 g1 row3 be1
    #                             row4 b1(0:4H)    row5 b2 row6 g2 row7 be2
    H, NH, HD = HIDDEN, N_HEADS, HEAD_DIM
    scale = 1.0 / math.sqrt(HD)

    # ---- input projection + positional encoding (batch folded: (B*S, H)) ----
    h = jnp.dot(x_ref[...], misc_ref[_MISC_PROJ_W:_MISC_PROJ_W + INPUT_SIZE, :],
                preferred_element_type=jnp.float32)
    h = h + misc_ref[_MISC_PROJ_B:_MISC_PROJ_B + 1, :]
    pe = misc_ref[_MISC_PE:_MISC_PE + S, :]                     # (S, H)
    h = h + jnp.concatenate([pe] * B, axis=0)                   # row (b,s) gets pe[s]

    # block-diagonal additive mask: 0 within a sequence, -1e9 across batches
    neg = misc_ref[_MISC_MASK:_MISC_MASK + T, 0:T]              # (T, T)

    # ---- transformer blocks (static unroll) ----
    for blk in range(N_BLOCKS):
        # fused QKV projection: ONE (T,H)@(H,3H) matmul
        qkv = jnp.dot(h, wa_ref[blk, 0:H, 0:3 * H],
                      preferred_element_type=jnp.float32)
        qkv = qkv + vec_ref[blk, 0:1, 0:3 * H]                  # (T, 3H)

        # split heads with static lane slices -> (NH, T, HD)
        qh = jnp.stack([qkv[:, n * HD:(n + 1) * HD] for n in range(NH)], axis=0)
        kh = jnp.stack([qkv[:, H + n * HD:H + (n + 1) * HD] for n in range(NH)], axis=0)
        vh = jnp.stack([qkv[:, 2 * H + n * HD:2 * H + (n + 1) * HD] for n in range(NH)], axis=0)

        # head-batched scores over the folded batch axis + block-diag mask
        sc = jnp.einsum('nqd,nkd->nqk', qh, kh,
                        preferred_element_type=jnp.float32) * scale + neg
        sc = sc - jnp.max(sc, axis=-1, keepdims=True)
        pr = jnp.exp(sc)
        pr = pr * _recip(jnp.sum(pr, axis=-1, keepdims=True))
        ctx = jnp.einsum('nqk,nkd->nqd', pr, vh,
                         preferred_element_type=jnp.float32)    # (NH, T, HD)

        # reassemble heads along lanes; ONE dense (T,H)@(H,H) output projection
        ctx_flat = jnp.concatenate([ctx[n] for n in range(NH)], axis=-1)   # (T, H)
        attn = jnp.dot(ctx_flat, wa_ref[blk, 0:H, 3 * H:4 * H],
                       preferred_element_type=jnp.float32)
        attn = attn + vec_ref[blk, 1:2, 0:H]

        h1 = _layernorm(attn + h, vec_ref[blk, 2:3, 0:H], vec_ref[blk, 3:4, 0:H])

        # FFN
        ffn = jnp.dot(h1, wa_ref[blk, H:2 * H, :],
                      preferred_element_type=jnp.float32) + vec_ref[blk, 4:5, :]
        ffn = _gelu_exact(ffn)
        ffn = jnp.dot(ffn, w2_ref[blk],
                      preferred_element_type=jnp.float32) + vec_ref[blk, 5:6, 0:H]
        h = _layernorm(ffn + h1, vec_ref[blk, 6:7, 0:H], vec_ref[blk, 7:8, 0:H])

    # ---- BertPooler on token 0 of each sequence ----
    first = jnp.concatenate([h[b * S:b * S + 1, :] for b in range(B)], axis=0)  # (B, H)
    pooled = jnp.dot(first, misc_ref[_MISC_POOL_W:_MISC_POOL_W + HIDDEN, :],
                     preferred_element_type=jnp.float32)
    o_ref[...] = jnp.tanh(pooled + misc_ref[_MISC_POOL_B:_MISC_POOL_B + 1, :])


# ----------------------------- wrapper --------------------------------------
def _pad_lanes(v, width):
    return jnp.pad(v, ((0, 0), (0, width - v.shape[1])))


def pack_params(params):
    # block-diagonal attention mask (cross-batch entries -> -1e9)
    bid = jnp.arange(T, dtype=jnp.int32) // S
    mask = jnp.where(bid[:, None] == bid[None, :], 0.0, -1e9).astype(jnp.float32)

    misc = jnp.concatenate([
        params["proj_w"],                 # rows [0,16)
        params["pool_w"],                 # rows [16,48)
        params["pe"],                     # rows [48,56)
        params["proj_b"],                 # row 56
        params["pool_b"],                 # row 57
        _pad_lanes(mask, HIDDEN),         # rows [58,74), lanes [0,T)
    ], axis=0)                            # (_MISC_ROWS, HIDDEN)

    wa_list, w2_list, vec_list = [], [], []
    for (wq, bq, wk, bk, wv, bv, wo, bo, g1, be1,
         w1, b1, w2, b2, g2, be2) in params["blocks"]:
        w_qkvo = jnp.concatenate([wq, wk, wv, wo], axis=1)       # (H, 4H)
        wa_list.append(jnp.concatenate([w_qkvo, w1], axis=0))    # (2H, 4H)
        w2_list.append(w2)                                       # (4H, H)
        b_qkv = jnp.concatenate([bq, bk, bv], axis=1)            # (1, 3H)
        vec_list.append(jnp.concatenate(
            [_pad_lanes(v, INTERMEDIATE) for v in
             (b_qkv, bo, g1, be1, b1, b2, g2, be2)], axis=0))    # (8, 4H)

    return (misc,
            jnp.stack(wa_list, axis=0),     # (N_BLOCKS, 2H, 4H)
            jnp.stack(w2_list, axis=0),     # (N_BLOCKS, 4H, H)
            jnp.stack(vec_list, axis=0))    # (N_BLOCKS, 8, 4H)


def submodal_vital_forward(x, params):
    xf = x.reshape(T, INPUT_SIZE)
    misc, wa, w2, vec = pack_params(params)      # 5 input DMAs total (incl. x)
    inputs = [xf, misc, wa, w2, vec]
    return pl.pallas_call(
        fused_kernel,
        out_shape=jax.ShapeDtypeStruct((B, HIDDEN), jnp.float32),
        grid_spec=pltpu.PrefetchScalarGridSpec(
            num_scalar_prefetch=0, grid=(1,),
            in_specs=[_full_spec(a.shape) for a in inputs],
            out_specs=_full_spec((B, HIDDEN))),
    )(*inputs)


# ----------------------------- parameters -----------------------------------
def make_positional_encoding(seq_len, d_model):
    position = jnp.arange(seq_len, dtype=jnp.float32)[:, None]
    div_term = jnp.exp(jnp.arange(0, d_model, 2, dtype=jnp.float32)
                       * (-math.log(10000.0) / d_model))
    pe = jnp.zeros((seq_len, d_model), dtype=jnp.float32)
    pe = pe.at[:, 0::2].set(jnp.sin(position * div_term))
    pe = pe.at[:, 1::2].set(jnp.cos(position * div_term))
    return pe


def init_params(key):
    def dense(k, fan_in, fan_out):
        w = 0.02 * jax.random.normal(k, (fan_in, fan_out), dtype=jnp.float32)
        b = jnp.zeros((1, fan_out), dtype=jnp.float32)
        return w, b

    keys = jax.random.split(key, 3 + 6 * N_BLOCKS)
    ki = iter(keys)

    params = {}
    params["proj_w"], params["proj_b"] = dense(next(ki), INPUT_SIZE, HIDDEN)

    blocks = []
    for _ in range(N_BLOCKS):
        wq, bq = dense(next(ki), HIDDEN, HIDDEN)
        wk, bk = dense(next(ki), HIDDEN, HIDDEN)
        wv, bv = dense(next(ki), HIDDEN, HIDDEN)
        wo, bo = dense(next(ki), HIDDEN, HIDDEN)
        g1 = jnp.ones((1, HIDDEN), jnp.float32)
        be1 = jnp.zeros((1, HIDDEN), jnp.float32)
        w1, b1 = dense(next(ki), HIDDEN, INTERMEDIATE)
        w2, b2 = dense(next(ki), INTERMEDIATE, HIDDEN)
        g2 = jnp.ones((1, HIDDEN), jnp.float32)
        be2 = jnp.zeros((1, HIDDEN), jnp.float32)
        blocks.append((wq, bq, wk, bk, wv, bv, wo, bo,
                       g1, be1, w1, b1, w2, b2, g2, be2))
    params["blocks"] = blocks

    params["pool_w"], params["pool_b"] = dense(next(ki), HIDDEN, HIDDEN)
    params["pe"] = make_positional_encoding(S, HIDDEN)
    return params


# ----------------------------- main ------------------------------------------
if __name__ == "__main__":
    key = jax.random.PRNGKey(0)
    k_param, k_x = jax.random.split(key)
    params = init_params(k_param)
    x = jax.random.normal(k_x, (B, S, INPUT_SIZE), dtype=jnp.float32)

    out = submodal_vital_forward(x, params)
    out = jax.block_until_ready(out)
    assert out.shape == (B, HIDDEN) and jnp.all(jnp.isfinite(out))
    print("KERNEL_OK")
</pallas_src>

<mosaic_0001>
module attributes {stable_mosaic.version = 11 : i64} {
  func.func @fused_kernel(%arg0: i32, %arg1: memref<16x16xf32, #tpu.memory_space<vmem>>, %arg2: memref<74x32xf32, #tpu.memory_space<vmem>>, %arg3: memref<2x64x128xf32, #tpu.memory_space<vmem>>, %arg4: memref<2x128x32xf32, #tpu.memory_space<vmem>>, %arg5: memref<2x8x128xf32, #tpu.memory_space<vmem>>, %arg6: memref<2x32xf32, #tpu.memory_space<vmem>>) attributes {dimension_semantics = [#tpu.dimension_semantics<arbitrary>], iteration_bounds = array<i64: 1>, scalar_prefetch = 0 : i64, scratch_operands = 0 : i64, tpu.core_type = #tpu.core_type<tc>, window_params = [{pipeline_mode = #tpu.pipeline_mode<synchronous>, transform_indices = @transform_0, window_bounds = array<i64: 16, 16>}, {pipeline_mode = #tpu.pipeline_mode<synchronous>, transform_indices = @transform_1, window_bounds = array<i64: 74, 32>}, {pipeline_mode = #tpu.pipeline_mode<synchronous>, transform_indices = @transform_2, window_bounds = array<i64: 2, 64, 128>}, {pipeline_mode = #tpu.pipeline_mode<synchronous>, transform_indices = @transform_3, window_bounds = array<i64: 2, 128, 32>}, {pipeline_mode = #tpu.pipeline_mode<synchronous>, transform_indices = @transform_4, window_bounds = array<i64: 2, 8, 128>}, {pipeline_mode = #tpu.pipeline_mode<synchronous>, transform_indices = @transform_5, window_bounds = array<i64: 2, 32>}]} {
    %c0 = arith.constant 0 : index
    %c0_0 = arith.constant 0 : index
    %0 = vector.load %arg1[%c0, %c0_0] : memref<16x16xf32, #tpu.memory_space<vmem>>, vector<16x16xf32>
    %c0_1 = arith.constant 0 : index
    %c0_2 = arith.constant 0 : index
    %1 = vector.load %arg2[%c0_1, %c0_2] : memref<74x32xf32, #tpu.memory_space<vmem>>, vector<16x32xf32>
    %cst = arith.constant dense<0.000000e+00> : vector<16x32xf32>
    %2 = tpu.matmul %0, %1, %cst {dimension_numbers = #tpu.dot_dimension_numbers<[1], [0], [0], [1], [0, 0, 1, 1], [], []>} : vector<16x16xf32>, vector<16x32xf32>, vector<16x32xf32> -> vector<16x32xf32>
    %c56 = arith.constant 56 : index
    %c0_3 = arith.constant 0 : index
    %3 = vector.load %arg2[%c56, %c0_3] : memref<74x32xf32, #tpu.memory_space<vmem>>, vector<1x32xf32>
    %4 = vector.broadcast %3 : vector<1x32xf32> to vector<16x32xf32>
    %5 = arith.addf %2, %4 : vector<16x32xf32>
    %c48 = arith.constant 48 : index
    %c0_4 = arith.constant 0 : index
    %6 = vector.load %arg2[%c48, %c0_4] : memref<74x32xf32, #tpu.memory_space<vmem>>, vector<8x32xf32>
    %7 = tpu.concatenate %6, %6 in 0 : vector<8x32xf32>, vector<8x32xf32> -> vector<16x32xf32>
    %8 = arith.addf %5, %7 : vector<16x32xf32>
    %c58 = arith.constant 58 : index
    %c0_5 = arith.constant 0 : index
    %9 = vector.load %arg2[%c58, %c0_5] : memref<74x32xf32, #tpu.memory_space<vmem>>, vector<16x16xf32>
    %c0_6 = arith.constant 0 : index
    %c0_7 = arith.constant 0 : index
    %c0_8 = arith.constant 0 : index
    %10 = vector.load %arg3[%c0_6, %c0_7, %c0_8] : memref<2x64x128xf32, #tpu.memory_space<vmem>>, vector<1x32x96xf32>
    %11 = vector.shape_cast %10 : vector<1x32x96xf32> to vector<32x96xf32>
    %cst_9 = arith.constant dense<0.000000e+00> : vector<16x96xf32>
    %12 = tpu.matmul %8, %11, %cst_9 {dimension_numbers = #tpu.dot_dimension_numbers<[1], [0], [0], [1], [0, 0, 1, 1], [], []>} : vector<16x32xf32>, vector<32x96xf32>, vector<16x96xf32> -> vector<16x96xf32>
    %c0_10 = arith.constant 0 : index
    %c0_11 = arith.constant 0 : index
    %c0_12 = arith.constant 0 : index
    %13 = vector.load %arg5[%c0_10, %c0_11, %c0_12] : memref<2x8x128xf32, #tpu.memory_space<vmem>>, vector<1x1x96xf32>
    %14 = vector.shape_cast %13 : vector<1x1x96xf32> to vector<1x96xf32>
    %15 = vector.broadcast %14 : vector<1x96xf32> to vector<16x96xf32>
    %16 = arith.addf %12, %15 : vector<16x96xf32>
    %17 = vector.extract_strided_slice %16 {offsets = [0, 0], sizes = [16, 8], strides = [1, 1]} : vector<16x96xf32> to vector<16x8xf32>
    %18 = vector.extract_strided_slice %16 {offsets = [0, 8], sizes = [16, 8], strides = [1, 1]} : vector<16x96xf32> to vector<16x8xf32>
    %19 = vector.extract_strided_slice %16 {offsets = [0, 16], sizes = [16, 8], strides = [1, 1]} : vector<16x96xf32> to vector<16x8xf32>
    %20 = vector.extract_strided_slice %16 {offsets = [0, 24], sizes = [16, 8], strides = [1, 1]} : vector<16x96xf32> to vector<16x8xf32>
    %21 = vector.shape_cast %17 : vector<16x8xf32> to vector<1x16x8xf32>
    %22 = vector.shape_cast %18 : vector<16x8xf32> to vector<1x16x8xf32>
    %23 = vector.shape_cast %19 : vector<16x8xf32> to vector<1x16x8xf32>
    %24 = vector.shape_cast %20 : vector<16x8xf32> to vector<1x16x8xf32>
    %25 = tpu.concatenate %21, %22, %23, %24 in 0 : vector<1x16x8xf32>, vector<1x16x8xf32>, vector<1x16x8xf32>, vector<1x16x8xf32> -> vector<4x16x8xf32>
    %26 = vector.extract_strided_slice %16 {offsets = [0, 32], sizes = [16, 8], strides = [1, 1]} : vector<16x96xf32> to vector<16x8xf32>
    %27 = vector.extract_strided_slice %16 {offsets = [0, 40], sizes = [16, 8], strides = [1, 1]} : vector<16x96xf32> to vector<16x8xf32>
    %28 = vector.extract_strided_slice %16 {offsets = [0, 48], sizes = [16, 8], strides = [1, 1]} : vector<16x96xf32> to vector<16x8xf32>
    %29 = vector.extract_strided_slice %16 {offsets = [0, 56], sizes = [16, 8], strides = [1, 1]} : vector<16x96xf32> to vector<16x8xf32>
    %30 = vector.shape_cast %26 : vector<16x8xf32> to vector<1x16x8xf32>
    %31 = vector.shape_cast %27 : vector<16x8xf32> to vector<1x16x8xf32>
    %32 = vector.shape_cast %28 : vector<16x8xf32> to vector<1x16x8xf32>
    %33 = vector.shape_cast %29 : vector<16x8xf32> to vector<1x16x8xf32>
    %34 = tpu.concatenate %30, %31, %32, %33 in 0 : vector<1x16x8xf32>, vector<1x16x8xf32>, vector<1x16x8xf32>, vector<1x16x8xf32> -> vector<4x16x8xf32>
    %35 = vector.extract_strided_slice %16 {offsets = [0, 64], sizes = [16, 8], strides = [1, 1]} : vector<16x96xf32> to vector<16x8xf32>
    %36 = vector.extract_strided_slice %16 {offsets = [0, 72], sizes = [16, 8], strides = [1, 1]} : vector<16x96xf32> to vector<16x8xf32>
    %37 = vector.extract_strided_slice %16 {offsets = [0, 80], sizes = [16, 8], strides = [1, 1]} : vector<16x96xf32> to vector<16x8xf32>
    %38 = vector.extract_strided_slice %16 {offsets = [0, 88], sizes = [16, 8], strides = [1, 1]} : vector<16x96xf32> to vector<16x8xf32>
    %39 = vector.shape_cast %35 : vector<16x8xf32> to vector<1x16x8xf32>
    %40 = vector.shape_cast %36 : vector<16x8xf32> to vector<1x16x8xf32>
    %41 = vector.shape_cast %37 : vector<16x8xf32> to vector<1x16x8xf32>
    %42 = vector.shape_cast %38 : vector<16x8xf32> to vector<1x16x8xf32>
    %43 = tpu.concatenate %39, %40, %41, %42 in 0 : vector<1x16x8xf32>, vector<1x16x8xf32>, vector<1x16x8xf32>, vector<1x16x8xf32> -> vector<4x16x8xf32>
    "tpu.trace_start"() <{level = 10 : i32, message = "nqd,nkd->nqk"}> : () -> ()
    %cst_13 = arith.constant dense<0.000000e+00> : vector<4x16x16xf32>
    %44 = tpu.matmul %25, %34, %cst_13 {dimension_numbers = #tpu.dot_dimension_numbers<[2], [2], [1], [1], [0, 0, 0, 1, 1, 1], [0], [0]>} : vector<4x16x8xf32>, vector<4x16x8xf32>, vector<4x16x16xf32> -> vector<4x16x16xf32>
    "tpu.trace_stop"() : () -> ()
    %cst_14 = arith.constant 0.353553385 : f32
    %45 = vector.broadcast %cst_14 : f32 to vector<4x16x16xf32>
    %46 = arith.mulf %44, %45 : vector<4x16x16xf32>
    %47 = vector.shape_cast %9 : vector<16x16xf32> to vector<1x16x16xf32>
    %48 = vector.broadcast %47 : vector<1x16x16xf32> to vector<4x16x16xf32>
    %49 = arith.addf %46, %48 : vector<4x16x16xf32>
    %cst_15 = arith.constant dense<0xFF800000> : vector<4x16xf32>
    %50 = vector.multi_reduction <maximumf>, %49, %cst_15 [2] : vector<4x16x16xf32> to vector<4x16xf32>
    %51 = vector.shape_cast %50 : vector<4x16xf32> to vector<4x16x1xf32>
    %52 = vector.broadcast %51 : vector<4x16x1xf32> to vector<4x16x16xf32>
    %53 = arith.subf %49, %52 : vector<4x16x16xf32>
    %54 = math.exp %53 : vector<4x16x16xf32>
    %cst_16 = arith.constant dense<0.000000e+00> : vector<4x16xf32>
    %55 = vector.multi_reduction <add>, %54, %cst_16 [2] : vector<4x16x16xf32> to vector<4x16xf32>
    %56 = vector.shape_cast %55 : vector<4x16xf32> to vector<4x16x1xf32>
    %57 = tpu.reciprocal %56 {approx = true} : vector<4x16x1xf32> -> vector<4x16x1xf32>
    %58 = arith.mulf %56, %57 : vector<4x16x1xf32>
    %cst_17 = arith.constant 2.000000e+00 : f32
    %59 = vector.broadcast %cst_17 : f32 to vector<4x16x1xf32>
    %60 = arith.subf %59, %58 : vector<4x16x1xf32>
    %61 = arith.mulf %57, %60 : vector<4x16x1xf32>
    %62 = vector.broadcast %61 : vector<4x16x1xf32> to vector<4x16x16xf32>
    %63 = arith.mulf %54, %62 : vector<4x16x16xf32>
    "tpu.trace_start"() <{level = 10 : i32, message = "nqk,nkd->nqd"}> : () -> ()
    %cst_18 = arith.constant dense<0.000000e+00> : vector<4x16x8xf32>
    %64 = tpu.matmul %63, %43, %cst_18 {dimension_numbers = #tpu.dot_dimension_numbers<[2], [1], [1], [2], [0, 0, 0, 1, 1, 2], [0], [0]>} : vector<4x16x16xf32>, vector<4x16x8xf32>, vector<4x16x8xf32> -> vector<4x16x8xf32>
    "tpu.trace_stop"() : () -> ()
    %65 = vector.extract_strided_slice %64 {offsets = [0, 0, 0], sizes = [1, 16, 8], strides = [1, 1, 1]} : vector<4x16x8xf32> to vector<1x16x8xf32>
    %66 = vector.shape_cast %65 : vector<1x16x8xf32> to vector<16x8xf32>
    %67 = vector.extract_strided_slice %64 {offsets = [1, 0, 0], sizes = [1, 16, 8], strides = [1, 1, 1]} : vector<4x16x8xf32> to vector<1x16x8xf32>
    %68 = vector.shape_cast %67 : vector<1x16x8xf32> to vector<16x8xf32>
    %69 = vector.extract_strided_slice %64 {offsets = [2, 0, 0], sizes = [1, 16, 8], strides = [1, 1, 1]} : vector<4x16x8xf32> to vector<1x16x8xf32>
    %70 = vector.shape_cast %69 : vector<1x16x8xf32> to vector<16x8xf32>
    %71 = vector.extract_strided_slice %64 {offsets = [3, 0, 0], sizes = [1, 16, 8], strides = [1, 1, 1]} : vector<4x16x8xf32> to vector<1x16x8xf32>
    %72 = vector.shape_cast %71 : vector<1x16x8xf32> to vector<16x8xf32>
    %73 = tpu.concatenate %66, %68, %70, %72 in 1 : vector<16x8xf32>, vector<16x8xf32>, vector<16x8xf32>, vector<16x8xf32> -> vector<16x32xf32>
    %c0_19 = arith.constant 0 : index
    %c0_20 = arith.constant 0 : index
    %c96 = arith.constant 96 : index
    %74 = vector.load %arg3[%c0_19, %c0_20, %c96] : memref<2x64x128xf32, #tpu.memory_space<vmem>>, vector<1x32x32xf32>
    %75 = vector.shape_cast %74 : vector<1x32x32xf32> to vector<32x32xf32>
    %cst_21 = arith.constant dense<0.000000e+00> : vector<16x32xf32>
    %76 = tpu.matmul %73, %75, %cst_21 {dimension_numbers = #tpu.dot_dimension_numbers<[1], [0], [0], [1], [0, 0, 1, 1], [], []>} : vector<16x32xf32>, vector<32x32xf32>, vector<16x32xf32> -> vector<16x32xf32>
    %c0_22 = arith.constant 0 : index
    %c1 = arith.constant 1 : index
    %c0_23 = arith.constant 0 : index
    %77 = vector.load %arg5[%c0_22, %c1, %c0_23] : memref<2x8x128xf32, #tpu.memory_space<vmem>>, vector<1x1x32xf32>
    %78 = vector.shape_cast %77 : vector<1x1x32xf32> to vector<1x32xf32>
    %79 = vector.broadcast %78 : vector<1x32xf32> to vector<16x32xf32>
    %80 = arith.addf %76, %79 : vector<16x32xf32>
    %81 = arith.addf %80, %8 : vector<16x32xf32>
    %c0_24 = arith.constant 0 : index
    %c2 = arith.constant 2 : index
    %c0_25 = arith.constant 0 : index
    %82 = vector.load %arg5[%c0_24, %c2, %c0_25] : memref<2x8x128xf32, #tpu.memory_space<vmem>>, vector<1x1x32xf32>
    %83 = vector.shape_cast %82 : vector<1x1x32xf32> to vector<1x32xf32>
    %c0_26 = arith.constant 0 : index
    %c3 = arith.constant 3 : index
    %c0_27 = arith.constant 0 : index
    %84 = vector.load %arg5[%c0_26, %c3, %c0_27] : memref<2x8x128xf32, #tpu.memory_space<vmem>>, vector<1x1x32xf32>
    %85 = vector.shape_cast %84 : vector<1x1x32xf32> to vector<1x32xf32>
    %cst_28 = arith.constant dense<0.000000e+00> : vector<16xf32>
    %86 = vector.multi_reduction <add>, %81, %cst_28 [1] : vector<16x32xf32> to vector<16xf32>
    %87 = vector.shape_cast %86 : vector<16xf32> to vector<16x1xf32>
    %cst_29 = arith.constant 3.200000e+01 : f32
    %88 = vector.broadcast %cst_29 : f32 to vector<16x1xf32>
    %89 = arith.divf %87, %88 : vector<16x1xf32>
    %90 = vector.broadcast %89 : vector<16x1xf32> to vector<16x32xf32>
    %91 = arith.subf %81, %90 : vector<16x32xf32>
    %92 = arith.mulf %91, %91 : vector<16x32xf32>
    %cst_30 = arith.constant dense<0.000000e+00> : vector<16xf32>
    %93 = vector.multi_reduction <add>, %92, %cst_30 [1] : vector<16x32xf32> to vector<16xf32>
    %94 = vector.shape_cast %93 : vector<16xf32> to vector<16x1xf32>
    %cst_31 = arith.constant 3.200000e+01 : f32
    %95 = vector.broadcast %cst_31 : f32 to vector<16x1xf32>
    %96 = arith.divf %94, %95 : vector<16x1xf32>
    %97 = vector.broadcast %89 : vector<16x1xf32> to vector<16x32xf32>
    %98 = arith.subf %81, %97 : vector<16x32xf32>
    %cst_32 = arith.constant 9.99999996E-13 : f32
    %99 = vector.broadcast %cst_32 : f32 to vector<16x1xf32>
    %100 = arith.addf %96, %99 : vector<16x1xf32>
    %101 = math.rsqrt %100 : vector<16x1xf32>
    %102 = vector.broadcast %101 : vector<16x1xf32> to vector<16x32xf32>
    %103 = arith.mulf %98, %102 : vector<16x32xf32>
    %104 = vector.broadcast %83 : vector<1x32xf32> to vector<16x32xf32>
    %105 = arith.mulf %103, %104 : vector<16x32xf32>
    %106 = vector.broadcast %85 : vector<1x32xf32> to vector<16x32xf32>
    %107 = arith.addf %105, %106 : vector<16x32xf32>
    %c0_33 = arith.constant 0 : index
    %c32 = arith.constant 32 : index
    %c0_34 = arith.constant 0 : index
    %108 = vector.load %arg3[%c0_33, %c32, %c0_34] : memref<2x64x128xf32, #tpu.memory_space<vmem>>, vector<1x32x128xf32>
    %109 = vector.shape_cast %108 : vector<1x32x128xf32> to vector<32x128xf32>
    %cst_35 = arith.constant dense<0.000000e+00> : vector<16x128xf32>
    %110 = tpu.matmul %107, %109, %cst_35 {dimension_numbers = #tpu.dot_dimension_numbers<[1], [0], [0], [1], [0, 0, 1, 1], [], []>} : vector<16x32xf32>, vector<32x128xf32>, vector<16x128xf32> -> vector<16x128xf32>
    %c0_36 = arith.constant 0 : index
    %c4 = arith.constant 4 : index
    %c0_37 = arith.constant 0 : index
    %111 = vector.load %arg5[%c0_36, %c4, %c0_37] : memref<2x8x128xf32, #tpu.memory_space<vmem>>, vector<1x1x128xf32>
    %112 = vector.shape_cast %111 : vector<1x1x128xf32> to vector<1x128xf32>
    %113 = vector.broadcast %112 : vector<1x128xf32> to vector<16x128xf32>
    %114 = arith.addf %110, %113 : vector<16x128xf32>
    %cst_38 = arith.constant 5.000000e-01 : f32
    %115 = vector.broadcast %cst_38 : f32 to vector<16x128xf32>
    %116 = arith.mulf %115, %114 : vector<16x128xf32>
    %cst_39 = arith.constant 0.707106769 : f32
    %117 = vector.broadcast %cst_39 : f32 to vector<16x128xf32>
    %118 = arith.mulf %114, %117 : vector<16x128xf32>
    %cst_40 = arith.constant 0.000000e+00 : f32
    %119 = vector.broadcast %cst_40 : f32 to vector<16x128xf32>
    %120 = arith.cmpf oge, %118, %119 : vector<16x128xf32>
    %cst_41 = arith.constant 1.000000e+00 : f32
    %cst_42 = arith.constant -1.000000e+00 : f32
    %121 = vector.broadcast %cst_41 : f32 to vector<16x128xf32>
    %122 = vector.broadcast %cst_42 : f32 to vector<16x128xf32>
    %123 = arith.select %120, %121, %122 : vector<16x128xi1>, vector<16x128xf32>
    %124 = math.absf %118 : vector<16x128xf32>
    %cst_43 = arith.constant 0.327591091 : f32
    %125 = vector.broadcast %cst_43 : f32 to vector<16x128xf32>
    %126 = arith.mulf %125, %124 : vector<16x128xf32>
    %cst_44 = arith.constant 1.000000e+00 : f32
    %127 = vector.broadcast %cst_44 : f32 to vector<16x128xf32>
    %128 = arith.addf %127, %126 : vector<16x128xf32>
    %129 = tpu.reciprocal %128 {approx = true} : vector<16x128xf32> -> vector<16x128xf32>
    %130 = arith.mulf %128, %129 : vector<16x128xf32>
    %cst_45 = arith.constant 2.000000e+00 : f32
    %131 = vector.broadcast %cst_45 : f32 to vector<16x128xf32>
    %132 = arith.subf %131, %130 : vector<16x128xf32>
    %133 = arith.mulf %129, %132 : vector<16x128xf32>
    %cst_46 = arith.constant 1.06140542 : f32
    %134 = vector.broadcast %cst_46 : f32 to vector<16x128xf32>
    %135 = arith.mulf %134, %133 : vector<16x128xf32>
    %cst_47 = arith.constant -1.45315206 : f32
    %136 = vector.broadcast %cst_47 : f32 to vector<16x128xf32>
    %137 = arith.addf %135, %136 : vector<16x128xf32>
    %138 = arith.mulf %137, %133 : vector<16x128xf32>
    %cst_48 = arith.constant 1.42141378 : f32
    %139 = vector.broadcast %cst_48 : f32 to vector<16x128xf32>
    %140 = arith.addf %138, %139 : vector<16x128xf32>
    %141 = arith.mulf %140, %133 : vector<16x128xf32>
    %cst_49 = arith.constant -0.284496725 : f32
    %142 = vector.broadcast %cst_49 : f32 to vector<16x128xf32>
    %143 = arith.addf %141, %142 : vector<16x128xf32>
    %144 = arith.mulf %143, %133 : vector<16x128xf32>
    %cst_50 = arith.constant 0.254829586 : f32
    %145 = vector.broadcast %cst_50 : f32 to vector<16x128xf32>
    %146 = arith.addf %144, %145 : vector<16x128xf32>
    %147 = arith.mulf %146, %133 : vector<16x128xf32>
    %cst_51 = arith.constant 0.000000e+00 : f32
    %148 = vector.broadcast %cst_51 : f32 to vector<16x128xf32>
    %149 = arith.subf %148, %124 : vector<16x128xf32>
    %150 = arith.mulf %149, %124 : vector<16x128xf32>
    %151 = math.exp %150 : vector<16x128xf32>
    %152 = arith.mulf %147, %151 : vector<16x128xf32>
    %cst_52 = arith.constant 1.000000e+00 : f32
    %153 = vector.broadcast %cst_52 : f32 to vector<16x128xf32>
    %154 = arith.subf %153, %152 : vector<16x128xf32>
    %155 = arith.mulf %123, %154 : vector<16x128xf32>
    %cst_53 = arith.constant 1.000000e+00 : f32
    %156 = vector.broadcast %cst_53 : f32 to vector<16x128xf32>
    %157 = arith.addf %156, %155 : vector<16x128xf32>
    %158 = arith.mulf %116, %157 : vector<16x128xf32>
    %c0_54 = arith.constant 0 : index
    %c0_55 = arith.constant 0 : index
    %c0_56 = arith.constant 0 : index
    %159 = vector.load %arg4[%c0_54, %c0_55, %c0_56] : memref<2x128x32xf32, #tpu.memory_space<vmem>>, vector<1x128x32xf32>
    %160 = vector.shape_cast %159 : vector<1x128x32xf32> to vector<128x32xf32>
    %cst_57 = arith.constant dense<0.000000e+00> : vector<16x32xf32>
    %161 = tpu.matmul %158, %160, %cst_57 {dimension_numbers = #tpu.dot_dimension_numbers<[1], [0], [0], [1], [0, 0, 1, 1], [], []>} : vector<16x128xf32>, vector<128x32xf32>, vector<16x32xf32> -> vector<16x32xf32>
    %c0_58 = arith.constant 0 : index
    %c5 = arith.constant 5 : index
    %c0_59 = arith.constant 0 : index
    %162 = vector.load %arg5[%c0_58, %c5, %c0_59] : memref<2x8x128xf32, #tpu.memory_space<vmem>>, vector<1x1x32xf32>
    %163 = vector.shape_cast %162 : vector<1x1x32xf32> to vector<1x32xf32>
    %164 = vector.broadcast %163 : vector<1x32xf32> to vector<16x32xf32>
    %165 = arith.addf %161, %164 : vector<16x32xf32>
    %166 = arith.addf %165, %107 : vector<16x32xf32>
    %c0_60 = arith.constant 0 : index
    %c6 = arith.constant 6 : index
    %c0_61 = arith.constant 0 : index
    %167 = vector.load %arg5[%c0_60, %c6, %c0_61] : memref<2x8x128xf32, #tpu.memory_space<vmem>>, vector<1x1x32xf32>
    %168 = vector.shape_cast %167 : vector<1x1x32xf32> to vector<1x32xf32>
    %c0_62 = arith.constant 0 : index
    %c7 = arith.constant 7 : index
    %c0_63 = arith.constant 0 : index
    %169 = vector.load %arg5[%c0_62, %c7, %c0_63] : memref<2x8x128xf32, #tpu.memory_space<vmem>>, vector<1x1x32xf32>
    %170 = vector.shape_cast %169 : vector<1x1x32xf32> to vector<1x32xf32>
    %cst_64 = arith.constant dense<0.000000e+00> : vector<16xf32>
    %171 = vector.multi_reduction <add>, %166, %cst_64 [1] : vector<16x32xf32> to vector<16xf32>
    %172 = vector.shape_cast %171 : vector<16xf32> to vector<16x1xf32>
    %cst_65 = arith.constant 3.200000e+01 : f32
    %173 = vector.broadcast %cst_65 : f32 to vector<16x1xf32>
    %174 = arith.divf %172, %173 : vector<16x1xf32>
    %175 = vector.broadcast %174 : vector<16x1xf32> to vector<16x32xf32>
    %176 = arith.subf %166, %175 : vector<16x32xf32>
    %177 = arith.mulf %176, %176 : vector<16x32xf32>
    %cst_66 = arith.constant dense<0.000000e+00> : vector<16xf32>
    %178 = vector.multi_reduction <add>, %177, %cst_66 [1] : vector<16x32xf32> to vector<16xf32>
    %179 = vector.shape_cast %178 : vector<16xf32> to vector<16x1xf32>
    %cst_67 = arith.constant 3.200000e+01 : f32
    %180 = vector.broadcast %cst_67 : f32 to vector<16x1xf32>
    %181 = arith.divf %179, %180 : vector<16x1xf32>
    %182 = vector.broadcast %174 : vector<16x1xf32> to vector<16x32xf32>
    %183 = arith.subf %166, %182 : vector<16x32xf32>
    %cst_68 = arith.constant 9.99999996E-13 : f32
    %184 = vector.broadcast %cst_68 : f32 to vector<16x1xf32>
    %185 = arith.addf %181, %184 : vector<16x1xf32>
    %186 = math.rsqrt %185 : vector<16x1xf32>
    %187 = vector.broadcast %186 : vector<16x1xf32> to vector<16x32xf32>
    %188 = arith.mulf %183, %187 : vector<16x32xf32>
    %189 = vector.broadcast %168 : vector<1x32xf32> to vector<16x32xf32>
    %190 = arith.mulf %188, %189 : vector<16x32xf32>
    %191 = vector.broadcast %170 : vector<1x32xf32> to vector<16x32xf32>
    %192 = arith.addf %190, %191 : vector<16x32xf32>
    %c1_69 = arith.constant 1 : index
    %c0_70 = arith.constant 0 : index
    %c0_71 = arith.constant 0 : index
    %193 = vector.load %arg3[%c1_69, %c0_70, %c0_71] : memref<2x64x128xf32, #tpu.memory_space<vmem>>, vector<1x32x96xf32>
    %194 = vector.shape_cast %193 : vector<1x32x96xf32> to vector<32x96xf32>
    %cst_72 = arith.constant dense<0.000000e+00> : vector<16x96xf32>
    %195 = tpu.matmul %192, %194, %cst_72 {dimension_numbers = #tpu.dot_dimension_numbers<[1], [0], [0], [1], [0, 0, 1, 1], [], []>} : vector<16x32xf32>, vector<32x96xf32>, vector<16x96xf32> -> vector<16x96xf32>
    %c1_73 = arith.constant 1 : index
    %c0_74 = arith.constant 0 : index
    %c0_75 = arith.constant 0 : index
    %196 = vector.load %arg5[%c1_73, %c0_74, %c0_75] : memref<2x8x128xf32, #tpu.memory_space<vmem>>, vector<1x1x96xf32>
    %197 = vector.shape_cast %196 : vector<1x1x96xf32> to vector<1x96xf32>
    %198 = vector.broadcast %197 : vector<1x96xf32> to vector<16x96xf32>
    %199 = arith.addf %195, %198 : vector<16x96xf32>
    %200 = vector.extract_strided_slice %199 {offsets = [0, 0], sizes = [16, 8], strides = [1, 1]} : vector<16x96xf32> to vector<16x8xf32>
    %201 = vector.extract_strided_slice %199 {offsets = [0, 8], sizes = [16, 8], strides = [1, 1]} : vector<16x96xf32> to vector<16x8xf32>
    %202 = vector.extract_strided_slice %199 {offsets = [0, 16], sizes = [16, 8], strides = [1, 1]} : vector<16x96xf32> to vector<16x8xf32>
    %203 = vector.extract_strided_slice %199 {offsets = [0, 24], sizes = [16, 8], strides = [1, 1]} : vector<16x96xf32> to vector<16x8xf32>
    %204 = vector.shape_cast %200 : vector<16x8xf32> to vector<1x16x8xf32>
    %205 = vector.shape_cast %201 : vector<16x8xf32> to vector<1x16x8xf32>
    %206 = vector.shape_cast %202 : vector<16x8xf32> to vector<1x16x8xf32>
    %207 = vector.shape_cast %203 : vector<16x8xf32> to vector<1x16x8xf32>
    %208 = tpu.concatenate %204, %205, %206, %207 in 0 : vector<1x16x8xf32>, vector<1x16x8xf32>, vector<1x16x8xf32>, vector<1x16x8xf32> -> vector<4x16x8xf32>
    %209 = vector.extract_strided_slice %199 {offsets = [0, 32], sizes = [16, 8], strides = [1, 1]} : vector<16x96xf32> to vector<16x8xf32>
    %210 = vector.extract_strided_slice %199 {offsets = [0, 40], sizes = [16, 8], strides = [1, 1]} : vector<16x96xf32> to vector<16x8xf32>
    %211 = vector.extract_strided_slice %199 {offsets = [0, 48], sizes = [16, 8], strides = [1, 1]} : vector<16x96xf32> to vector<16x8xf32>
    %212 = vector.extract_strided_slice %199 {offsets = [0, 56], sizes = [16, 8], strides = [1, 1]} : vector<16x96xf32> to vector<16x8xf32>
    %213 = vector.shape_cast %209 : vector<16x8xf32> to vector<1x16x8xf32>
    %214 = vector.shape_cast %210 : vector<16x8xf32> to vector<1x16x8xf32>
    %215 = vector.shape_cast %211 : vector<16x8xf32> to vector<1x16x8xf32>
    %216 = vector.shape_cast %212 : vector<16x8xf32> to vector<1x16x8xf32>
    %217 = tpu.concatenate %213, %214, %215, %216 in 0 : vector<1x16x8xf32>, vector<1x16x8xf32>, vector<1x16x8xf32>, vector<1x16x8xf32> -> vector<4x16x8xf32>
    %218 = vector.extract_strided_slice %199 {offsets = [0, 64], sizes = [16, 8], strides = [1, 1]} : vector<16x96xf32> to vector<16x8xf32>
    %219 = vector.extract_strided_slice %199 {offsets = [0, 72], sizes = [16, 8], strides = [1, 1]} : vector<16x96xf32> to vector<16x8xf32>
    %220 = vector.extract_strided_slice %199 {offsets = [0, 80], sizes = [16, 8], strides = [1, 1]} : vector<16x96xf32> to vector<16x8xf32>
    %221 = vector.extract_strided_slice %199 {offsets = [0, 88], sizes = [16, 8], strides = [1, 1]} : vector<16x96xf32> to vector<16x8xf32>
    %222 = vector.shape_cast %218 : vector<16x8xf32> to vector<1x16x8xf32>
    %223 = vector.shape_cast %219 : vector<16x8xf32> to vector<1x16x8xf32>
    %224 = vector.shape_cast %220 : vector<16x8xf32> to vector<1x16x8xf32>
    %225 = vector.shape_cast %221 : vector<16x8xf32> to vector<1x16x8xf32>
    %226 = tpu.concatenate %222, %223, %224, %225 in 0 : vector<1x16x8xf32>, vector<1x16x8xf32>, vector<1x16x8xf32>, vector<1x16x8xf32> -> vector<4x16x8xf32>
    "tpu.trace_start"() <{level = 10 : i32, message = "nqd,nkd->nqk"}> : () -> ()
    %cst_76 = arith.constant dense<0.000000e+00> : vector<4x16x16xf32>
    %227 = tpu.matmul %208, %217, %cst_76 {dimension_numbers = #tpu.dot_dimension_numbers<[2], [2], [1], [1], [0, 0, 0, 1, 1, 1], [0], [0]>} : vector<4x16x8xf32>, vector<4x16x8xf32>, vector<4x16x16xf32> -> vector<4x16x16xf32>
    "tpu.trace_stop"() : () -> ()
    %cst_77 = arith.constant 0.353553385 : f32
    %228 = vector.broadcast %cst_77 : f32 to vector<4x16x16xf32>
    %229 = arith.mulf %227, %228 : vector<4x16x16xf32>
    %230 = vector.shape_cast %9 : vector<16x16xf32> to vector<1x16x16xf32>
    %231 = vector.broadcast %230 : vector<1x16x16xf32> to vector<4x16x16xf32>
    %232 = arith.addf %229, %231 : vector<4x16x16xf32>
    %cst_78 = arith.constant dense<0xFF800000> : vector<4x16xf32>
    %233 = vector.multi_reduction <maximumf>, %232, %cst_78 [2] : vector<4x16x16xf32> to vector<4x16xf32>
    %234 = vector.shape_cast %233 : vector<4x16xf32> to vector<4x16x1xf32>
    %235 = vector.broadcast %234 : vector<4x16x1xf32> to vector<4x16x16xf32>
    %236 = arith.subf %232, %235 : vector<4x16x16xf32>
    %237 = math.exp %236 : vector<4x16x16xf32>
    %cst_79 = arith.constant dense<0.000000e+00> : vector<4x16xf32>
    %238 = vector.multi_reduction <add>, %237, %cst_79 [2] : vector<4x16x16xf32> to vector<4x16xf32>
    %239 = vector.shape_cast %238 : vector<4x16xf32> to vector<4x16x1xf32>
    %240 = tpu.reciprocal %239 {approx = true} : vector<4x16x1xf32> -> vector<4x16x1xf32>
    %241 = arith.mulf %239, %240 : vector<4x16x1xf32>
    %cst_80 = arith.constant 2.000000e+00 : f32
    %242 = vector.broadcast %cst_80 : f32 to vector<4x16x1xf32>
    %243 = arith.subf %242, %241 : vector<4x16x1xf32>
    %244 = arith.mulf %240, %243 : vector<4x16x1xf32>
    %245 = vector.broadcast %244 : vector<4x16x1xf32> to vector<4x16x16xf32>
    %246 = arith.mulf %237, %245 : vector<4x16x16xf32>
    "tpu.trace_start"() <{level = 10 : i32, message = "nqk,nkd->nqd"}> : () -> ()
    %cst_81 = arith.constant dense<0.000000e+00> : vector<4x16x8xf32>
    %247 = tpu.matmul %246, %226, %cst_81 {dimension_numbers = #tpu.dot_dimension_numbers<[2], [1], [1], [2], [0, 0, 0, 1, 1, 2], [0], [0]>} : vector<4x16x16xf32>, vector<4x16x8xf32>, vector<4x16x8xf32> -> vector<4x16x8xf32>
    "tpu.trace_stop"() : () -> ()
    %248 = vector.extract_strided_slice %247 {offsets = [0, 0, 0], sizes = [1, 16, 8], strides = [1, 1, 1]} : vector<4x16x8xf32> to vector<1x16x8xf32>
    %249 = vector.shape_cast %248 : vector<1x16x8xf32> to vector<16x8xf32>
    %250 = vector.extract_strided_slice %247 {offsets = [1, 0, 0], sizes = [1, 16, 8], strides = [1, 1, 1]} : vector<4x16x8xf32> to vector<1x16x8xf32>
    %251 = vector.shape_cast %250 : vector<1x16x8xf32> to vector<16x8xf32>
    %252 = vector.extract_strided_slice %247 {offsets = [2, 0, 0], sizes = [1, 16, 8], strides = [1, 1, 1]} : vector<4x16x8xf32> to vector<1x16x8xf32>
    %253 = vector.shape_cast %252 : vector<1x16x8xf32> to vector<16x8xf32>
    %254 = vector.extract_strided_slice %247 {offsets = [3, 0, 0], sizes = [1, 16, 8], strides = [1, 1, 1]} : vector<4x16x8xf32> to vector<1x16x8xf32>
    %255 = vector.shape_cast %254 : vector<1x16x8xf32> to vector<16x8xf32>
    %256 = tpu.concatenate %249, %251, %253, %255 in 1 : vector<16x8xf32>, vector<16x8xf32>, vector<16x8xf32>, vector<16x8xf32> -> vector<16x32xf32>
    %c1_82 = arith.constant 1 : index
    %c0_83 = arith.constant 0 : index
    %c96_84 = arith.constant 96 : index
    %257 = vector.load %arg3[%c1_82, %c0_83, %c96_84] : memref<2x64x128xf32, #tpu.memory_space<vmem>>, vector<1x32x32xf32>
    %258 = vector.shape_cast %257 : vector<1x32x32xf32> to vector<32x32xf32>
    %cst_85 = arith.constant dense<0.000000e+00> : vector<16x32xf32>
    %259 = tpu.matmul %256, %258, %cst_85 {dimension_numbers = #tpu.dot_dimension_numbers<[1], [0], [0], [1], [0, 0, 1, 1], [], []>} : vector<16x32xf32>, vector<32x32xf32>, vector<16x32xf32> -> vector<16x32xf32>
    %c1_86 = arith.constant 1 : index
    %c1_87 = arith.constant 1 : index
    %c0_88 = arith.constant 0 : index
    %260 = vector.load %arg5[%c1_86, %c1_87, %c0_88] : memref<2x8x128xf32, #tpu.memory_space<vmem>>, vector<1x1x32xf32>
    %261 = vector.shape_cast %260 : vector<1x1x32xf32> to vector<1x32xf32>
    %262 = vector.broadcast %261 : vector<1x32xf32> to vector<16x32xf32>
    %263 = arith.addf %259, %262 : vector<16x32xf32>
    %264 = arith.addf %263, %192 : vector<16x32xf32>
    %c1_89 = arith.constant 1 : index
    %c2_90 = arith.constant 2 : index
    %c0_91 = arith.constant 0 : index
    %265 = vector.load %arg5[%c1_89, %c2_90, %c0_91] : memref<2x8x128xf32, #tpu.memory_space<vmem>>, vector<1x1x32xf32>
    %266 = vector.shape_cast %265 : vector<1x1x32xf32> to vector<1x32xf32>
    %c1_92 = arith.constant 1 : index
    %c3_93 = arith.constant 3 : index
    %c0_94 = arith.constant 0 : index
    %267 = vector.load %arg5[%c1_92, %c3_93, %c0_94] : memref<2x8x128xf32, #tpu.memory_space<vmem>>, vector<1x1x32xf32>
    %268 = vector.shape_cast %267 : vector<1x1x32xf32> to vector<1x32xf32>
    %cst_95 = arith.constant dense<0.000000e+00> : vector<16xf32>
    %269 = vector.multi_reduction <add>, %264, %cst_95 [1] : vector<16x32xf32> to vector<16xf32>
    %270 = vector.shape_cast %269 : vector<16xf32> to vector<16x1xf32>
    %cst_96 = arith.constant 3.200000e+01 : f32
    %271 = vector.broadcast %cst_96 : f32 to vector<16x1xf32>
    %272 = arith.divf %270, %271 : vector<16x1xf32>
    %273 = vector.broadcast %272 : vector<16x1xf32> to vector<16x32xf32>
    %274 = arith.subf %264, %273 : vector<16x32xf32>
    %275 = arith.mulf %274, %274 : vector<16x32xf32>
    %cst_97 = arith.constant dense<0.000000e+00> : vector<16xf32>
    %276 = vector.multi_reduction <add>, %275, %cst_97 [1] : vector<16x32xf32> to vector<16xf32>
    %277 = vector.shape_cast %276 : vector<16xf32> to vector<16x1xf32>
    %cst_98 = arith.constant 3.200000e+01 : f32
    %278 = vector.broadcast %cst_98 : f32 to vector<16x1xf32>
    %279 = arith.divf %277, %278 : vector<16x1xf32>
    %280 = vector.broadcast %272 : vector<16x1xf32> to vector<16x32xf32>
    %281 = arith.subf %264, %280 : vector<16x32xf32>
    %cst_99 = arith.constant 9.99999996E-13 : f32
    %282 = vector.broadcast %cst_99 : f32 to vector<16x1xf32>
    %283 = arith.addf %279, %282 : vector<16x1xf32>
    %284 = math.rsqrt %283 : vector<16x1xf32>
    %285 = vector.broadcast %284 : vector<16x1xf32> to vector<16x32xf32>
    %286 = arith.mulf %281, %285 : vector<16x32xf32>
    %287 = vector.broadcast %266 : vector<1x32xf32> to vector<16x32xf32>
    %288 = arith.mulf %286, %287 : vector<16x32xf32>
    %289 = vector.broadcast %268 : vector<1x32xf32> to vector<16x32xf32>
    %290 = arith.addf %288, %289 : vector<16x32xf32>
    %c1_100 = arith.constant 1 : index
    %c32_101 = arith.constant 32 : index
    %c0_102 = arith.constant 0 : index
    %291 = vector.load %arg3[%c1_100, %c32_101, %c0_102] : memref<2x64x128xf32, #tpu.memory_space<vmem>>, vector<1x32x128xf32>
    %292 = vector.shape_cast %291 : vector<1x32x128xf32> to vector<32x128xf32>
    %cst_103 = arith.constant dense<0.000000e+00> : vector<16x128xf32>
    %293 = tpu.matmul %290, %292, %cst_103 {dimension_numbers = #tpu.dot_dimension_numbers<[1], [0], [0], [1], [0, 0, 1, 1], [], []>} : vector<16x32xf32>, vector<32x128xf32>, vector<16x128xf32> -> vector<16x128xf32>
    %c1_104 = arith.constant 1 : index
    %c4_105 = arith.constant 4 : index
    %c0_106 = arith.constant 0 : index
    %294 = vector.load %arg5[%c1_104, %c4_105, %c0_106] : memref<2x8x128xf32, #tpu.memory_space<vmem>>, vector<1x1x128xf32>
    %295 = vector.shape_cast %294 : vector<1x1x128xf32> to vector<1x128xf32>
    %296 = vector.broadcast %295 : vector<1x128xf32> to vector<16x128xf32>
    %297 = arith.addf %293, %296 : vector<16x128xf32>
    %cst_107 = arith.constant 5.000000e-01 : f32
    %298 = vector.broadcast %cst_107 : f32 to vector<16x128xf32>
    %299 = arith.mulf %298, %297 : vector<16x128xf32>
    %cst_108 = arith.constant 0.707106769 : f32
    %300 = vector.broadcast %cst_108 : f32 to vector<16x128xf32>
    %301 = arith.mulf %297, %300 : vector<16x128xf32>
    %cst_109 = arith.constant 0.000000e+00 : f32
    %302 = vector.broadcast %cst_109 : f32 to vector<16x128xf32>
    %303 = arith.cmpf oge, %301, %302 : vector<16x128xf32>
    %cst_110 = arith.constant 1.000000e+00 : f32
    %cst_111 = arith.constant -1.000000e+00 : f32
    %304 = vector.broadcast %cst_110 : f32 to vector<16x128xf32>
    %305 = vector.broadcast %cst_111 : f32 to vector<16x128xf32>
    %306 = arith.select %303, %304, %305 : vector<16x128xi1>, vector<16x128xf32>
    %307 = math.absf %301 : vector<16x128xf32>
    %cst_112 = arith.constant 0.327591091 : f32
    %308 = vector.broadcast %cst_112 : f32 to vector<16x128xf32>
    %309 = arith.mulf %308, %307 : vector<16x128xf32>
    %cst_113 = arith.constant 1.000000e+00 : f32
    %310 = vector.broadcast %cst_113 : f32 to vector<16x128xf32>
    %311 = arith.addf %310, %309 : vector<16x128xf32>
    %312 = tpu.reciprocal %311 {approx = true} : vector<16x128xf32> -> vector<16x128xf32>
    %313 = arith.mulf %311, %312 : vector<16x128xf32>
    %cst_114 = arith.constant 2.000000e+00 : f32
    %314 = vector.broadcast %cst_114 : f32 to vector<16x128xf32>
    %315 = arith.subf %314, %313 : vector<16x128xf32>
    %316 = arith.mulf %312, %315 : vector<16x128xf32>
    %cst_115 = arith.constant 1.06140542 : f32
    %317 = vector.broadcast %cst_115 : f32 to vector<16x128xf32>
    %318 = arith.mulf %317, %316 : vector<16x128xf32>
    %cst_116 = arith.constant -1.45315206 : f32
    %319 = vector.broadcast %cst_116 : f32 to vector<16x128xf32>
    %320 = arith.addf %318, %319 : vector<16x128xf32>
    %321 = arith.mulf %320, %316 : vector<16x128xf32>
    %cst_117 = arith.constant 1.42141378 : f32
    %322 = vector.broadcast %cst_117 : f32 to vector<16x128xf32>
    %323 = arith.addf %321, %322 : vector<16x128xf32>
    %324 = arith.mulf %323, %316 : vector<16x128xf32>
    %cst_118 = arith.constant -0.284496725 : f32
    %325 = vector.broadcast %cst_118 : f32 to vector<16x128xf32>
    %326 = arith.addf %324, %325 : vector<16x128xf32>
    %327 = arith.mulf %326, %316 : vector<16x128xf32>
    %cst_119 = arith.constant 0.254829586 : f32
    %328 = vector.broadcast %cst_119 : f32 to vector<16x128xf32>
    %329 = arith.addf %327, %328 : vector<16x128xf32>
    %330 = arith.mulf %329, %316 : vector<16x128xf32>
    %cst_120 = arith.constant 0.000000e+00 : f32
    %331 = vector.broadcast %cst_120 : f32 to vector<16x128xf32>
    %332 = arith.subf %331, %307 : vector<16x128xf32>
    %333 = arith.mulf %332, %307 : vector<16x128xf32>
    %334 = math.exp %333 : vector<16x128xf32>
    %335 = arith.mulf %330, %334 : vector<16x128xf32>
    %cst_121 = arith.constant 1.000000e+00 : f32
    %336 = vector.broadcast %cst_121 : f32 to vector<16x128xf32>
    %337 = arith.subf %336, %335 : vector<16x128xf32>
    %338 = arith.mulf %306, %337 : vector<16x128xf32>
    %cst_122 = arith.constant 1.000000e+00 : f32
    %339 = vector.broadcast %cst_122 : f32 to vector<16x128xf32>
    %340 = arith.addf %339, %338 : vector<16x128xf32>
    %341 = arith.mulf %299, %340 : vector<16x128xf32>
    %c1_123 = arith.constant 1 : index
    %c0_124 = arith.constant 0 : index
    %c0_125 = arith.constant 0 : index
    %342 = vector.load %arg4[%c1_123, %c0_124, %c0_125] : memref<2x128x32xf32, #tpu.memory_space<vmem>>, vector<1x128x32xf32>
    %343 = vector.shape_cast %342 : vector<1x128x32xf32> to vector<128x32xf32>
    %cst_126 = arith.constant dense<0.000000e+00> : vector<16x32xf32>
    %344 = tpu.matmul %341, %343, %cst_126 {dimension_numbers = #tpu.dot_dimension_numbers<[1], [0], [0], [1], [0, 0, 1, 1], [], []>} : vector<16x128xf32>, vector<128x32xf32>, vector<16x32xf32> -> vector<16x32xf32>
    %c1_127 = arith.constant 1 : index
    %c5_128 = arith.constant 5 : index
    %c0_129 = arith.constant 0 : index
    %345 = vector.load %arg5[%c1_127, %c5_128, %c0_129] : memref<2x8x128xf32, #tpu.memory_space<vmem>>, vector<1x1x32xf32>
    %346 = vector.shape_cast %345 : vector<1x1x32xf32> to vector<1x32xf32>
    %347 = vector.broadcast %346 : vector<1x32xf32> to vector<16x32xf32>
    %348 = arith.addf %344, %347 : vector<16x32xf32>
    %349 = arith.addf %348, %290 : vector<16x32xf32>
    %c1_130 = arith.constant 1 : index
    %c6_131 = arith.constant 6 : index
    %c0_132 = arith.constant 0 : index
    %350 = vector.load %arg5[%c1_130, %c6_131, %c0_132] : memref<2x8x128xf32, #tpu.memory_space<vmem>>, vector<1x1x32xf32>
    %351 = vector.shape_cast %350 : vector<1x1x32xf32> to vector<1x32xf32>
    %c1_133 = arith.constant 1 : index
    %c7_134 = arith.constant 7 : index
    %c0_135 = arith.constant 0 : index
    %352 = vector.load %arg5[%c1_133, %c7_134, %c0_135] : memref<2x8x128xf32, #tpu.memory_space<vmem>>, vector<1x1x32xf32>
    %353 = vector.shape_cast %352 : vector<1x1x32xf32> to vector<1x32xf32>
    %cst_136 = arith.constant dense<0.000000e+00> : vector<16xf32>
    %354 = vector.multi_reduction <add>, %349, %cst_136 [1] : vector<16x32xf32> to vector<16xf32>
    %355 = vector.shape_cast %354 : vector<16xf32> to vector<16x1xf32>
    %cst_137 = arith.constant 3.200000e+01 : f32
    %356 = vector.broadcast %cst_137 : f32 to vector<16x1xf32>
    %357 = arith.divf %355, %356 : vector<16x1xf32>
    %358 = vector.broadcast %357 : vector<16x1xf32> to vector<16x32xf32>
    %359 = arith.subf %349, %358 : vector<16x32xf32>
    %360 = arith.mulf %359, %359 : vector<16x32xf32>
    %cst_138 = arith.constant dense<0.000000e+00> : vector<16xf32>
    %361 = vector.multi_reduction <add>, %360, %cst_138 [1] : vector<16x32xf32> to vector<16xf32>
    %362 = vector.shape_cast %361 : vector<16xf32> to vector<16x1xf32>
    %cst_139 = arith.constant 3.200000e+01 : f32
    %363 = vector.broadcast %cst_139 : f32 to vector<16x1xf32>
    %364 = arith.divf %362, %363 : vector<16x1xf32>
    %365 = vector.broadcast %357 : vector<16x1xf32> to vector<16x32xf32>
    %366 = arith.subf %349, %365 : vector<16x32xf32>
    %cst_140 = arith.constant 9.99999996E-13 : f32
    %367 = vector.broadcast %cst_140 : f32 to vector<16x1xf32>
    %368 = arith.addf %364, %367 : vector<16x1xf32>
    %369 = math.rsqrt %368 : vector<16x1xf32>
    %370 = vector.broadcast %369 : vector<16x1xf32> to vector<16x32xf32>
    %371 = arith.mulf %366, %370 : vector<16x32xf32>
    %372 = vector.broadcast %351 : vector<1x32xf32> to vector<16x32xf32>
    %373 = arith.mulf %371, %372 : vector<16x32xf32>
    %374 = vector.broadcast %353 : vector<1x32xf32> to vector<16x32xf32>
    %375 = arith.addf %373, %374 : vector<16x32xf32>
    %376 = vector.extract_strided_slice %375 {offsets = [0, 0], sizes = [1, 32], strides = [1, 1]} : vector<16x32xf32> to vector<1x32xf32>
    %377 = vector.extract_strided_slice %375 {offsets = [8, 0], sizes = [1, 32], strides = [1, 1]} : vector<16x32xf32> to vector<1x32xf32>
    %378 = tpu.concatenate %376, %377 in 0 : vector<1x32xf32>, vector<1x32xf32> -> vector<2x32xf32>
    %c16 = arith.constant 16 : index
    %c0_141 = arith.constant 0 : index
    %379 = vector.load %arg2[%c16, %c0_141] : memref<74x32xf32, #tpu.memory_space<vmem>>, vector<32x32xf32>
    %cst_142 = arith.constant dense<0.000000e+00> : vector<2x32xf32>
    %380 = tpu.matmul %378, %379, %cst_142 {dimension_numbers = #tpu.dot_dimension_numbers<[1], [0], [0], [1], [0, 0, 1, 1], [], []>} : vector<2x32xf32>, vector<32x32xf32>, vector<2x32xf32> -> vector<2x32xf32>
    %c57 = arith.constant 57 : index
    %c0_143 = arith.constant 0 : index
    %381 = vector.load %arg2[%c57, %c0_143] : memref<74x32xf32, #tpu.memory_space<vmem>>, vector<1x32xf32>
    %382 = vector.broadcast %381 : vector<1x32xf32> to vector<2x32xf32>
    %383 = arith.addf %380, %382 : vector<2x32xf32>
    %384 = math.tanh %383 : vector<2x32xf32>
    %c0_144 = arith.constant 0 : index
    %c0_145 = arith.constant 0 : index
    %385 = vector.load %arg6[%c0_144, %c0_145] : memref<2x32xf32, #tpu.memory_space<vmem>>, vector<2x32xf32>
    tpu.vector_store %arg6[%c0_144, %c0_145], %384 {strides = array<i32>} : memref<2x32xf32, #tpu.memory_space<vmem>>, vector<2x32xf32>,
    return
  }
  func.func @transform_0(%arg0: i32) -> (i32, i32) {
    %c0_i32 = arith.constant 0 : i32
    %c0_i32_0 = arith.constant 0 : i32
    %c0_i32_1 = arith.constant 0 : i32
    return %c0_i32, %c0_i32_0 : i32, i32
  }
  func.func @transform_1(%arg0: i32) -> (i32, i32) {
    %c0_i32 = arith.constant 0 : i32
    %c0_i32_0 = arith.constant 0 : i32
    %c0_i32_1 = arith.constant 0 : i32
    return %c0_i32, %c0_i32_0 : i32, i32
  }
  func.func @transform_2(%arg0: i32) -> (i32, i32, i32) {
    %c0_i32 = arith.constant 0 : i32
    %c0_i32_0 = arith.constant 0 : i32
    %c0_i32_1 = arith.constant 0 : i32
    %c0_i32_2 = arith.constant 0 : i32
    return %c0_i32, %c0_i32_0, %c0_i32_1 : i32, i32, i32
  }
  func.func @transform_3(%arg0: i32) -> (i32, i32, i32) {
    %c0_i32 = arith.constant 0 : i32
    %c0_i32_0 = arith.constant 0 : i32
    %c0_i32_1 = arith.constant 0 : i32
    %c0_i32_2 = arith.constant 0 : i32
    return %c0_i32, %c0_i32_0, %c0_i32_1 : i32, i32, i32
  }
  func.func @transform_4(%arg0: i32) -> (i32, i32, i32) {
    %c0_i32 = arith.constant 0 : i32
    %c0_i32_0 = arith.constant 0 : i32
    %c0_i32_1 = arith.constant 0 : i32
    %c0_i32_2 = arith.constant 0 : i32
    return %c0_i32, %c0_i32_0, %c0_i32_1 : i32, i32, i32
  }
  func.func @transform_5(%arg0: i32) -> (i32, i32) {
    %c0_i32 = arith.constant 0 : i32
    %c0_i32_0 = arith.constant 0 : i32
    %c0_i32_1 = arith.constant 0 : i32
    return %c0_i32, %c0_i32_0 : i32, i32
  }
}

</mosaic_0001>

<bundles_post_ra>
// kernel: tpu_custom_call.1
= control target key start
LH: loop header
LB: loop body
LE: loop exit
PB: predicated region body
PF: predicated region fallthrough
CT: control target
= control target key end

     0   :  { %vm30_vm0 = vcmask 130048   ;;  %s4397_s0 = inlined_call_operand.vmem [shape: f32[16,16], index: 0, kind: input, shape index: {}]   ;;  %s4398_s1 = inlined_call_operand.vmem [shape: f32[74,32], index: 1, kind: input, shape index: {}]   ;;  %s4399_s2 = inlined_call_operand.vmem [shape: f32[2,64,128], index: 2, kind: input, shape index: {}]   ;;  %s4400_s3 = inlined_call_operand.vmem [shape: f32[2,128,32], index: 3, kind: input, shape index: {}]   ;;  %s4401_s4 = inlined_call_operand.vmem [shape: f32[2,8,128], index: 4, kind: input, shape index: {}]   ;;  %s4402_s5 = inlined_call_operand.hbm [shape: f32[2,32], index: 5, kind: output, shape index: {}]  }
   0x1   :  { %v24_v0 = vld [vmem:[%s4398_s1 + $0x8] sm:$0xff]  ;;  %v23_v1 = vld [vmem:[%s4398_s1] sm:$0xff] }
   0x2   :  { %v21_v2 = vld [vmem:[%s4397_s0] sm:$0xff]  ;;  %3274 = vmatprep.subr.mxu0 %v24_v0 }
   0x3   :  { %3278 = vmatprep.mubr.msk.f32.mxu0 %vm30_vm0, %v21_v2 }
   0x4   :  { %10 = vsyncpa [#allocation3], 0  ;;  %3275 = vmatpush3.msra.mxu0 %v24_v0  ;;  %v22_v3 = vld [vmem:[%s4397_s0 + $0x8] sm:$0xff]  ;;  %v3735_v4 = vld [vmem:[%s4399_s2 + $0x18] sm:$0xff]  ;;  %vm126_vm1 = vcmask 261120   ;;  %vm226_vm2 = vcmask 64512  }
   0x5   :  { %3276 = vmatprep.subr.mxu0 %v23_v1  ;;  %v3742_v5 = vld [vmem:[%s4399_s2 + $0x10] sm:$0xff]  ;;  %v3749_v6 = vld [vmem:[%s4399_s2 + $0x8] sm:$0xff]  ;;  %v3756_v7 = vld [vmem:[%s4399_s2] sm:$0xff]  ;;  %s3675_s14 = smov 112   ;;  %s3676_s15 = smov 120   ;;  %vm1075_vm3 = vcmask 195584  }
   0x6   :  { %3277 = vmatpush3.msra.mxu0 %v23_v1  ;;  %v3012_v8 = vld [vmem:[%s4398_s1 + $0x38] ss:$0 sm:$0xff]  ;;  %v112_v12 = vld [vmem:[%s4398_s1 + $0x30] sm:$0xff]  ;;  %v3015_v16 = vld [vmem:[%s4401_s4] ss:$0 sm:$0xff]  ;;  %s3677_s16 = smov 104  }
   0x7   :  { %3279 = vmatmul.mubr.msk.f32.vlgmr.msra.gmra.mxu0 %vm30_vm0, %v22_v3  ;;  %3281 = vmatprep.subr.mxu0 %v3735_v4  ;;  %s3678_s17 = smov 96   ;;  %v116_v36 = vld [vmem:[%s4398_s1 + $0x42] sm:$0xff]  ;;  %v115_v39 = vld [vmem:[%s4398_s1 + $0x3a] sm:$0xff]  ;;  %s3679_s22 = smov 64   ;;  %vm3686_vm8 = vmmov 0   ;;  %vm2911_vm9 = vcmask 1040384  }
   0x8   :  { %3282 = vmatpush3.msra.mxu0 %v3735_v4  ;;  %s3680_s23 = smov 32   ;;  %s3681_s24 = smov 8   ;;  %vm2996_vm10 = vcmask 254976  }
   0x9   :  { %3283 = vmatprep.subr.mxu0 %v3742_v5  ;;  %s3682_s25 = smov 16   ;;  %s3683_s26 = smov 24  }
   0xa   :  { %3284 = vmatpush3.msra.mxu0 %v3742_v5  ;;  %s3687_s27 = smov [#allocation2]  }
   0xb   :  { %3285 = vmatprep.subr.mxu0 %v3749_v6 }
   0xc   :  { %3286 = vmatpush3.msra.mxu0 %v3749_v6 }
   0xd   :  { %3287 = vmatprep.subr.mxu0 %v3756_v7 }
   0xe   :  { %3288 = vmatpush3.msra.mxu0 %v3756_v7 }
  0xc7   :  { %v3280_v9 = vpop.f32.mrf.mxu0 }
  0xc8   :  { %v109_v10 = vadd.f32 %v3280_v9, %v3012_v8 }
  0xc9   :  { %v103_v11 = vpop.f32.mrf.mxu0 }
  0xca   :  { %v104_v13 = vadd.f32 %v3012_v8, %v103_v11  ;;  %v3768_v15 = vadd.f32 %v112_v12, %v109_v10 }
  0xcc   :  { %v3766_v14 = vadd.f32 %v112_v12, %v104_v13 }
  0xce   :  { %3289 = vmatprep.mubr.msk.f32.mxu0 %vm126_vm1, %v3766_v14 }
  0xcf   :  { %3290 = vmatmul.mubr.msk.f32.vlgmr.msra.gmra.mxu0 %vm126_vm1, %v3768_v15 }
 0x18f   :  { %v3291_v17 = vpop.f32.mrf.mxu0 }
 0x190   :  { %v3777_v18 = vadd.f32 %v3291_v17, %v3015_v16 }
 0x191   :  { %v199_v19 = vpop.f32.mrf.mxu0 }
 0x192   :  { %v3779_v20 = vadd.f32 %v3015_v16, %v199_v19  ;;  %216 = vrot.lane.b32.xlu1 %v3777_v18, %s3675_s14  ;;  %212 = vrot.lane.b32.xlu0 %v3777_v18, %s3676_s15 }
 0x194   :  { %3296 = vmatprep.mubr.msk.f32.mxu0 %vm226_vm2, %v3779_v20 }
 0x196   :  { %220 = vrot.lane.b32.xlu1 %v3777_v18, %s3677_s16  ;;  %210 = vrot.lane.b32.xlu0 %v3779_v20, %s3676_s15 }
 0x19a   :  { %218 = vrot.lane.b32.xlu1 %v3779_v20, %s3677_s16  ;;  %214 = vrot.lane.b32.xlu0 %v3779_v20, %s3675_s14 }
 0x19e   :  { %224 = vrot.lane.b32.xlu0 %v3777_v18, %s3678_s17 }
 0x1a2   :  { %222 = vrot.lane.b32.xlu0 %v3779_v20, %s3678_s17 }
 0x204   :  { %v3799_v21 = vpop.permute.xlu1 %216  ;;  %v3801_v22 = vpop.permute.xlu0 %212 }
 0x205   :  { %312 = vrot.lane.b32.xlu1 %v3801_v22, %s3678_s17  ;;  %399 = vrot.lane.b32.xlu0 %v3799_v21, %s3678_s17 }
 0x208   :  { %v3807_v23 = vpop.permute.xlu0 %210  ;;  %v3813_v24 = vpop.permute.xlu1 %220 }
 0x209   :  { %3303 = vmatprep.mubr.msk.f32.mxu1 %vm226_vm2, %v3807_v23  ;;  %310 = vrot.lane.b32.xlu1 %v3807_v23, %s3678_s17 }
 0x20c   :  { %v3815_v25 = vpop.permute.xlu0 %214  ;;  %v3821_v26 = vpop.permute.xlu1 %218 }
 0x20d   :  { %486 = vrot.lane.b32.xlu1 %v3813_v24, %s3678_s17  ;;  %397 = vrot.lane.b32.xlu0 %v3815_v25, %s3678_s17 }
 0x210   :  { %v225_v27 = vpop.permute.xlu0 %224 }
 0x211   :  { %484 = vrot.lane.b32.xlu1 %v3821_v26, %s3678_s17  ;;  %3292 = vmatprep.subr.msk.mxu0 %vm226_vm2, %v225_v27 }
 0x212   :  { %3293 = vmatpush3.xpose.msk.msra.mxu0 %vm226_vm2, %v225_v27 }
 0x214   :  { %v223_v28 = vpop.permute.xlu0 %222 }
 0x215   :  { %3294 = vmatprep.subr.msk.mxu0 %vm226_vm2, %v223_v28 }
 0x216   :  { %3295 = vmatpush3.xpose.msk.msra.mxu0 %vm226_vm2, %v223_v28 }
 0x219   :  { %3297 = vmatmul.mubr.msk.f32.vlgmr.msra.gmra.mxu0 %vm226_vm2, %v3777_v18 }
 0x21a   :  { %3310 = vmatprep.mubr.msk.f32.mxu0 %vm226_vm2, %v3815_v25 }
 0x277   :  { %v313_v29 = vpop.permute.xlu1 %312  ;;  %v400_v30 = vpop.permute.xlu0 %399 }
 0x278   :  { %3299 = vmatprep.subr.msk.mxu1 %vm226_vm2, %v313_v29  ;;  %3306 = vmatprep.subr.msk.mxu0 %vm226_vm2, %v400_v30 }
 0x279   :  { %3300 = vmatpush3.xpose.msk.msra.mxu1 %vm226_vm2, %v313_v29  ;;  %3307 = vmatpush3.xpose.msk.msra.mxu0 %vm226_vm2, %v400_v30 }
 0x27b   :  { %v311_v31 = vpop.permute.xlu1 %310 }
 0x27c   :  { %3301 = vmatprep.subr.msk.mxu1 %vm226_vm2, %v311_v31 }
 0x27d   :  { %3302 = vmatpush3.xpose.msk.msra.mxu1 %vm226_vm2, %v311_v31 }
 0x27f   :  { %v487_v32 = vpop.permute.xlu1 %486  ;;  %v398_v33 = vpop.permute.xlu0 %397 }
 0x280   :  { %3304 = vmatmul.mubr.msk.f32.vlgmr.msra.gmra.mxu1 %vm226_vm2, %v3801_v22  ;;  %3308 = vmatprep.subr.msk.mxu0 %vm226_vm2, %v398_v33 }
 0x281   :  { %3313 = vmatprep.subr.msk.mxu1 %vm226_vm2, %v487_v32  ;;  %3309 = vmatpush3.xpose.msk.msra.mxu0 %vm226_vm2, %v398_v33 }
 0x282   :  { %3314 = vmatpush3.xpose.msk.msra.mxu1 %vm226_vm2, %v487_v32  ;;  %3317 = vmatprep.mubr.msk.f32.mxu1 %vm226_vm2, %v3821_v26 }
 0x283   :  { %v485_v34 = vpop.permute.xlu1 %484 }
 0x284   :  { %3311 = vmatmul.mubr.msk.f32.vlgmr.msra.gmra.mxu0 %vm226_vm2, %v3799_v21  ;;  %3315 = vmatprep.subr.msk.mxu1 %vm226_vm2, %v485_v34 }
 0x286   :  { %3316 = vmatpush3.xpose.msk.msra.mxu1 %vm226_vm2, %v485_v34 }
 0x289   :  { %3318 = vmatmul.mubr.msk.f32.vlgmr.msra.gmra.mxu1 %vm226_vm2, %v3813_v24 }
 0x2d9   :  { %v3298_v35 = vpop.f32.mrf.mxu0 }
 0x2da   :  { %v572_v37 = vmul.f32 0.35355338, %v3298_v35 }
 0x2db   :  { %v301_v38 = vpop.f32.mrf.mxu0 }
 0x2dc   :  { %v571_v40 = vmul.f32 0.35355338, %v301_v38  ;;  %v580_v41 = vadd.f32 %v572_v37, %v116_v36 }
 0x2de   :  { %v590_v42 = vsel %vm30_vm0, %v580_v41, -inf  ;;  %v579_v43 = vadd.f32 %v571_v40, %v115_v39 }
 0x2df   :  { %591 = vmax.xlane.f32.xlu1 %v590_v42 }
 0x2e0   :  { %v587_v44 = vsel %vm30_vm0, %v579_v43, -inf }
 0x2e1   :  { %588 = vmax.xlane.f32.xlu0 %v587_v44 }
 0x340   :  { %v3305_v45 = vpop.f32.mrf.mxu1 }
 0x341   :  { %v574_v46 = vmul.f32 0.35355338, %v3305_v45 }
 0x342   :  { %v388_v47 = vpop.f32.mrf.mxu1 }
 0x343   :  { %v573_v48 = vmul.f32 0.35355338, %v388_v47  ;;  %v582_v49 = vadd.f32 %v574_v46, %v116_v36 }
 0x344   :  { %v3312_v50 = vpop.f32.mrf.mxu0 }
 0x345   :  { %v576_v51 = vmul.f32 0.35355338, %v3312_v50  ;;  %v596_v52 = vsel %vm30_vm0, %v582_v49, -inf  ;;  %v581_v53 = vadd.f32 %v573_v48, %v115_v39 }
 0x346   :  { %597 = vmax.xlane.f32.xlu0 %v596_v52  ;;  %v475_v54 = vpop.f32.mrf.mxu0 }
 0x347   :  { %v575_v55 = vmul.f32 0.35355338, %v475_v54  ;;  %v593_v57 = vsel %vm30_vm0, %v581_v53, -inf  ;;  %v584_v59 = vadd.f32 %v576_v51, %v116_v36 }
 0x349   :  { %v3319_v56 = vpop.f32.mrf.mxu1  ;;  %v583_v58 = vadd.f32 %v575_v55, %v115_v39  ;;  %v602_v0 = vsel %vm30_vm0, %v584_v59, -inf }
 0x34a   :  { %v578_v60 = vmul.f32 0.35355338, %v3319_v56  ;;  %594 = vmax.xlane.f32.xlu0 %v593_v57 }
 0x34b   :  { %v562_v61 = vpop.f32.mrf.mxu1  ;;  %v599_v62 = vsel %vm30_vm0, %v583_v58, -inf }
 0x34c   :  { %v577_v63 = vmul.f32 0.35355338, %v562_v61  ;;  %600 = vmax.xlane.f32.xlu1 %v599_v62  ;;  %v586_v1 = vadd.f32 %v578_v60, %v116_v36 }
 0x34e   :  { %603 = vmax.xlane.f32.xlu0 %v602_v0  ;;  %v585_v2 = vadd.f32 %v577_v63, %v115_v39  ;;  %v608_v8 = vsel %vm30_vm0, %v586_v1, -inf }
 0x350   :  { %v605_v3 = vsel %vm30_vm0, %v585_v2, -inf }
 0x351   :  { %606 = vmax.xlane.f32.xlu1 %v605_v3 }
 0x352   :  { %609 = vmax.xlane.f32.xlu0 %v608_v8 }
 0x362   :  { %701 = vrot.lane.b32.xlu1 %v3777_v18, %s3679_s22 }
 0x366   :  { %788 = vrot.lane.b32.xlu1 %v3801_v22, %s3679_s22 }
 0x368   :  { %699 = vrot.lane.b32.xlu0 %v3779_v20, %s3679_s22  ;;  %v592_v9 = vpop.xlane.xlu1 %591 }
 0x369   :  { %v612_v10 = vsub.f32 %v580_v41, %v592_v9 }
 0x36a   :  { %786 = vrot.lane.b32.xlu1 %v3807_v23, %s3679_s22  ;;  %v589_v12 = vpop.xlane.xlu0 %588 }
 0x36b   :  { %v621_v11 = vmul.f32 1.442695, %v612_v10  ;;  %v611_v13 = vsub.f32 %v579_v43, %v589_v12 }
 0x36c   :  { %875 = vrot.lane.b32.xlu0 %v3799_v21, %s3679_s22 }
 0x36d   :  { %3553 = vpow2.f32 %v621_v11  ;;  %v619_v16 = vmul.f32 1.442695, %v611_v13 }
 0x36e   :  { %962 = vrot.lane.b32.xlu1 %v3813_v24, %s3679_s22 }
 0x36f   :  { %3555 = vpow2.f32 %v619_v16 }
 0x37a   :  { %v3879_v17 = vpop.eup %3553 }
 0x37b   :  { %v638_v18 = vsel %vm30_vm0, %v3879_v17, 0.0 }
 0x37c   :  { %v3883_v19 = vpop.eup %3555 }
 0x37d   :  { %v635_v20 = vsel %vm30_vm0, %v3883_v19, 0.0 }
 0x38b   :  { %639 = vadd.xlane.f32.xlu0 %v638_v18 }
 0x392   :  { %636 = vadd.xlane.f32.xlu1 %v635_v20 }
 0x3cf   :  { %v598_v21 = vpop.xlane.xlu0 %597 }
 0x3d0   :  { %v614_v22 = vsub.f32 %v582_v49, %v598_v21 }
 0x3d2   :  { %v625_v23 = vmul.f32 1.442695, %v614_v22 }
 0x3d3   :  { %v595_v24 = vpop.xlane.xlu0 %594 }
 0x3d4   :  { %3557 = vpow2.f32 %v625_v23  ;;  %v613_v27 = vsub.f32 %v581_v53, %v595_v24 }
 0x3d5   :  { %v601_v28 = vpop.xlane.xlu1 %600 }
 0x3d6   :  { %v623_v29 = vmul.f32 1.442695, %v613_v27  ;;  %v615_v30 = vsub.f32 %v583_v58, %v601_v28 }
 0x3d7   :  { %v604_v31 = vpop.xlane.xlu0 %603 }
 0x3d8   :  { %3559 = vpow2.f32 %v623_v29  ;;  %v627_v32 = vmul.f32 1.442695, %v615_v30  ;;  %v616_v33 = vsub.f32 %v584_v59, %v604_v31 }
 0x3da   :  { %3561 = vpow2.f32 %v627_v32  ;;  %v629_v34 = vmul.f32 1.442695, %v616_v33  ;;  %v607_v35 = vpop.xlane.xlu1 %606 }
 0x3db   :  { %v617_v36 = vsub.f32 %v585_v2, %v607_v35  ;;  %v610_v37 = vpop.xlane.xlu0 %609 }
 0x3dc   :  { %3563 = vpow2.f32 %v629_v34  ;;  %v618_v38 = vsub.f32 %v586_v1, %v610_v37 }
 0x3dd   :  { %v631_v39 = vmul.f32 1.442695, %v617_v36 }
 0x3de   :  { %v633_v40 = vmul.f32 1.442695, %v618_v38  ;;  %v702_v41 = vpop.permute.xlu1 %701 }
 0x3df   :  { %3565 = vpow2.f32 %v631_v39  ;;  %3320 = vmatprep.subr.mxu0 %v702_v41  ;;  %v700_v42 = vpop.permute.xlu0 %699 }
 0x3e0   :  { %3567 = vpow2.f32 %v633_v40  ;;  %3321 = vmatpush3.msra.mxu0 %v702_v41 }
 0x3e1   :  { %v3887_v43 = vpop.eup %3557  ;;  %3322 = vmatprep.subr.mxu0 %v700_v42 }
 0x3e2   :  { %3323 = vmatpush3.msra.mxu0 %v700_v42  ;;  %v789_v44 = vpop.permute.xlu1 %788  ;;  %v644_v45 = vsel %vm30_vm0, %v3887_v43, 0.0 }
 0x3e3   :  { %3327 = vmatprep.subr.mxu0 %v789_v44  ;;  %645 = vadd.xlane.f32.xlu0 %v644_v45  ;;  %v876_v46 = vpop.permute.xlu0 %875 }
 0x3e4   :  { %3334 = vmatprep.subr.mxu1 %v876_v46 }
 0x3e5   :  { %v3891_v47 = vpop.eup %3559  ;;  %3335 = vmatpush3.msra.mxu1 %v876_v46 }
 0x3e6   :  { %v641_v48 = vsel %vm30_vm0, %v3891_v47, 0.0  ;;  %v787_v57 = vpop.permute.xlu1 %786 }
 0x3e7   :  { %v3895_v49 = vpop.eup %3561  ;;  %642 = vadd.xlane.f32.xlu1 %v641_v48 }
 0x3e8   :  { %v647_v52 = vsel %vm30_vm0, %v3895_v49, 0.0 }
 0x3e9   :  { %v3897_v50 = vpop.eup %3563 }
 0x3ea   :  { %v650_v51 = vsel %vm30_vm0, %v3897_v50, 0.0  ;;  %v3915_v59 = vpop.permute.xlu1 %962 }
 0x3eb   :  { %651 = vadd.xlane.f32.xlu0 %v650_v51  ;;  %648 = vadd.xlane.f32.xlu1 %v647_v52 }
 0x3ec   :  { %v3903_v53 = vpop.eup %3565 }
 0x3ed   :  { %v3905_v54 = vpop.eup %3567  ;;  %v653_v56 = vsel %vm30_vm0, %v3903_v53, 0.0 }
 0x3ee   :  { %v656_v55 = vsel %vm30_vm0, %v3905_v54, 0.0 }
 0x3ef   :  { %657 = vadd.xlane.f32.xlu0 %v656_v55  ;;  %654 = vadd.xlane.f32.xlu1 %v653_v56 }
 0x400   :  { %960 = vrot.lane.b32.xlu1 %v3821_v26, %s3679_s22 }
 0x404   :  { %1095 = vrot.lane.b32.xlu1 %v3742_v5, %s3680_s23 }
 0x405   :  { %873 = vrot.lane.b32.xlu0 %v3815_v25, %s3679_s22 }
 0x408   :  { %1093 = vrot.lane.b32.xlu1 %v3749_v6, %s3680_s23 }
 0x409   :  { %1097 = vrot.lane.b32.xlu0 %v3735_v4, %s3680_s23 }
 0x414   :  { %v640_v58 = vpop.xlane.xlu0 %639 }
 0x415   :  { %3569 = vrcp.f32 %v640_v58 }
 0x41b   :  { %v637_v60 = vpop.xlane.xlu1 %636 }
 0x41c   :  { %3571 = vrcp.f32 %v637_v60 }
 0x422   :  { %v3570_v61 = vpop.eup %3569 }
 0x423   :  { %v668_v62 = vmul.f32 %v3570_v61, %v640_v58 }
 0x425   :  { %v676_v0 = vsub.f32 2.0, %v668_v62 }
 0x427   :  { %v684_v3 = vmul.f32 %v3570_v61, %v676_v0 }
 0x429   :  { %v3572_v63 = vpop.eup %3571  ;;  %v692_v9 = vmul.f32 %v3879_v17, %v684_v3 }
 0x42a   :  { %v667_v1 = vmul.f32 %v3572_v63, %v637_v60 }
 0x42c   :  { %v675_v2 = vsub.f32 2.0, %v667_v1 }
 0x42e   :  { %v683_v8 = vmul.f32 %v3572_v63, %v675_v2 }
 0x430   :  { %v691_v26 = vmul.f32 %v3883_v19, %v683_v8 }
 0x432   :  { %3324 = vmatprep.mubr.msk.f32.mxu0 %vm30_vm0, %v691_v26 }
 0x433   :  { %3325 = vmatmul.mubr.msk.f32.vlgmr.msra.gmra.mxu0 %vm30_vm0, %v692_v9 }
 0x434   :  { %3328 = vmatpush3.msra.mxu0 %v789_v44 }
 0x435   :  { %3329 = vmatprep.subr.mxu0 %v787_v57 }
 0x436   :  { %3330 = vmatpush3.msra.mxu0 %v787_v57 }
 0x437   :  { %3341 = vmatprep.subr.mxu0 %v3915_v59 }
 0x46c   :  { %v646_v25 = vpop.xlane.xlu0 %645 }
 0x46d   :  { %3573 = vrcp.f32 %v646_v25 }
 0x470   :  { %v643_v10 = vpop.xlane.xlu1 %642 }
 0x471   :  { %3575 = vrcp.f32 %v643_v10 }
 0x474   :  { %v652_v11 = vpop.xlane.xlu0 %651  ;;  %v649_v12 = vpop.xlane.xlu1 %648 }
 0x475   :  { %3577 = vrcp.f32 %v652_v11 }
 0x476   :  { %3579 = vrcp.f32 %v649_v12 }
 0x478   :  { %v658_v13 = vpop.xlane.xlu0 %657  ;;  %v655_v16 = vpop.xlane.xlu1 %654 }
 0x479   :  { %3581 = vrcp.f32 %v658_v13 }
 0x47a   :  { %v3574_v17 = vpop.eup %3573  ;;  %3583 = vrcp.f32 %v655_v16 }
 0x47b   :  { %v670_v18 = vmul.f32 %v3574_v17, %v646_v25  ;;  %v3042_v25 = vld [vmem:[%s4401_s4 + $0x1] ss:$0 sm:$0xff] }
 0x47c   :  { %v874_v19 = vpop.permute.xlu0 %873  ;;  %v961_v41 = vpop.permute.xlu1 %960 }
 0x47d   :  { %3336 = vmatprep.subr.mxu1 %v874_v19  ;;  %v678_v21 = vsub.f32 2.0, %v670_v18 }
 0x47e   :  { %v3576_v20 = vpop.eup %3575  ;;  %3337 = vmatpush3.msra.mxu1 %v874_v19 }
 0x47f   :  { %v669_v22 = vmul.f32 %v3576_v20, %v643_v10  ;;  %v686_v24 = vmul.f32 %v3574_v17, %v678_v21 }
 0x480   :  { %v1098_v48 = vpop.permute.xlu0 %1097 }
 0x481   :  { %v677_v23 = vsub.f32 2.0, %v669_v22  ;;  %v694_v6 = vmul.f32 %v3887_v43, %v686_v24  ;;  %3348 = vmatprep.subr.mxu1 %v1098_v48 }
 0x482   :  { %v3578_v4 = vpop.eup %3577 }
 0x483   :  { %v3580_v27 = vpop.eup %3579  ;;  %v685_v5 = vmul.f32 %v3576_v20, %v677_v23  ;;  %v672_v28 = vmul.f32 %v3578_v4, %v652_v11 }
 0x484   :  { %v671_v29 = vmul.f32 %v3580_v27, %v649_v12 }
 0x485   :  { %v693_v30 = vmul.f32 %v3891_v47, %v685_v5  ;;  %v680_v31 = vsub.f32 2.0, %v672_v28 }
 0x486   :  { %v3582_v32 = vpop.eup %3581  ;;  %v679_v33 = vsub.f32 2.0, %v671_v29  ;;  %v1229_v29 = vld [vmem:[%s4399_s2 + $0x30] sm:$0xff] }
 0x487   :  { %v3584_v34 = vpop.eup %3583  ;;  %v688_v35 = vmul.f32 %v3578_v4, %v680_v31  ;;  %v674_v36 = vmul.f32 %v3582_v32, %v658_v13  ;;  %3331 = vmatprep.mubr.msk.f32.mxu0 %vm30_vm0, %v693_v30  ;;  %v1228_v30 = vld [vmem:[%s4399_s2 + $0x28] sm:$0xff]  ;;  %v1227_v31 = vld [vmem:[%s4399_s2 + $0x20] sm:$0xff] }
 0x488   :  { %v687_v37 = vmul.f32 %v3580_v27, %v679_v33  ;;  %v673_v38 = vmul.f32 %v3584_v34, %v655_v16  ;;  %3332 = vmatmul.mubr.msk.f32.vlgmr.msra.gmra.mxu0 %vm30_vm0, %v694_v6 }
 0x489   :  { %v696_v39 = vmul.f32 %v3897_v50, %v688_v35  ;;  %v682_v40 = vsub.f32 2.0, %v674_v36  ;;  %3342 = vmatpush3.msra.mxu0 %v3915_v59  ;;  %v1096_v50 = vpop.permute.xlu1 %1095 }
 0x48a   :  { %v695_v42 = vmul.f32 %v3895_v49, %v687_v37  ;;  %v681_v44 = vsub.f32 2.0, %v673_v38  ;;  %3343 = vmatprep.subr.mxu0 %v961_v41  ;;  %v3045_v38 = vld [vmem:[%s4401_s4 + $0x2] ss:$0 sm:$0xff] }
 0x48b   :  { %v690_v43 = vmul.f32 %v3582_v32, %v682_v40  ;;  %3344 = vmatpush3.msra.mxu0 %v961_v41  ;;  %v3046_v40 = vld [vmem:[%s4401_s4 + $0x3] ss:$0 sm:$0xff] }
 0x48c   :  { %v689_v45 = vmul.f32 %v3584_v34, %v681_v44  ;;  %3338 = vmatprep.mubr.msk.f32.mxu1 %vm30_vm0, %v695_v42 }
 0x48d   :  { %v698_v46 = vmul.f32 %v3905_v54, %v690_v43  ;;  %3339 = vmatmul.mubr.msk.f32.vlgmr.msra.gmra.mxu1 %vm30_vm0, %v696_v39  ;;  %v1094_v49 = vpop.permute.xlu1 %1093 }
 0x48e   :  { %v697_v47 = vmul.f32 %v3903_v53, %v689_v45  ;;  %3349 = vmatpush3.msra.mxu1 %v1098_v48  ;;  %v1389_v48 = vld [vmem:[%s4400_s3 + $0x70] sm:$0xff] }
 0x48f   :  { %3350 = vmatprep.subr.mxu1 %v1096_v50 }
 0x490   :  { %3345 = vmatprep.mubr.msk.f32.mxu0 %vm30_vm0, %v697_v47  ;;  %3351 = vmatpush3.msra.mxu1 %v1096_v50  ;;  %v1390_v47 = vld [vmem:[%s4400_s3 + $0x78] sm:$0xff]  ;;  %v1388_v50 = vld [vmem:[%s4400_s3 + $0x68] sm:$0xff] }
 0x491   :  { %3346 = vmatmul.mubr.msk.f32.vlgmr.msra.gmra.mxu0 %vm30_vm0, %v698_v46  ;;  %3352 = vmatprep.subr.mxu1 %v1094_v49 }
 0x492   :  { %3353 = vmatpush3.msra.mxu1 %v1094_v49  ;;  %v1387_v49 = vld [vmem:[%s4400_s3 + $0x60] sm:$0xff] }
 0x4f3   :  { %v3326_v51 = vpop.f32.mrf.mxu0 }
 0x4f5   :  { %v777_v52 = vpop.f32.mrf.mxu0 }
 0x548   :  { %v3333_v54 = vpop.f32.mrf.mxu0 }
 0x549   :  { %1051 = vrot.lane.b32.xlu0 %v3333_v54, %s3681_s24  ;;  %v1384_v54 = vld [vmem:[%s4400_s3 + $0x48] sm:$0xff] }
 0x54a   :  { %v864_v55 = vpop.f32.mrf.mxu0 }
 0x54d   :  { %v3340_v53 = vpop.f32.mrf.mxu1 }
 0x54e   :  { %1059 = vrot.lane.b32.xlu0 %v3340_v53, %s3682_s25  ;;  %v1383_v53 = vld [vmem:[%s4400_s3 + $0x40] sm:$0xff] }
 0x54f   :  { %v951_v56 = vpop.f32.mrf.mxu1 }
 0x550   :  { %1057 = vrot.lane.b32.xlu1 %v951_v56, %s3682_s25  ;;  %v1381_v56 = vld [vmem:[%s4400_s3 + $0x30] sm:$0xff] }
 0x551   :  { %v3347_v57 = vpop.f32.mrf.mxu0 }
 0x552   :  { %1049 = vrot.lane.b32.xlu0 %v864_v55, %s3681_s24  ;;  %v1382_v55 = vld [vmem:[%s4400_s3 + $0x38] sm:$0xff] }
 0x553   :  { %v1038_v58 = vpop.f32.mrf.mxu0 }
 0x554   :  { %1065 = vrot.lane.b32.xlu1 %v1038_v58, %s3683_s26  ;;  %v1379_v58 = vld [vmem:[%s4400_s3 + $0x20] sm:$0xff] }
 0x556   :  { %1091 = vrot.lane.b32.xlu0 %v3756_v7, %s3680_s23 }
 0x558   :  { %1067 = vrot.lane.b32.xlu1 %v3347_v57, %s3683_s26  ;;  %v1380_v57 = vld [vmem:[%s4400_s3 + $0x28] sm:$0xff] }
 0x5bb   :  { %v1052_v59 = vpop.permute.xlu0 %1051 }
 0x5bc   :  { %v1072_v8 = vsel %vm226_vm2, %v3326_v51, %v1052_v59  ;;  %v1386_v51 = vld [vmem:[%s4400_s3 + $0x58] sm:$0xff] }
 0x5bd   :  { %v1378_v59 = vld [vmem:[%s4400_s3 + $0x18] sm:$0xff] }
 0x5c0   :  { %v1060_v60 = vpop.permute.xlu0 %1059 }
 0x5c1   :  { %v1074_v7 = vsel %vm30_vm0, %v1072_v8, %v1060_v60  ;;  %v1377_v60 = vld [vmem:[%s4400_s3 + $0x10] sm:$0xff] }
 0x5c2   :  { %v1058_v61 = vpop.permute.xlu1 %1057 }
 0x5c4   :  { %v1050_v62 = vpop.permute.xlu0 %1049 }
 0x5c5   :  { %v1071_v63 = vsel %vm226_vm2, %v777_v52, %v1050_v62  ;;  %v1385_v52 = vld [vmem:[%s4400_s3 + $0x50] sm:$0xff]  ;;  %v1375_v62 = vld [vmem:[%s4400_s3] sm:$0xff] }
 0x5c6   :  { %v1073_v0 = vsel %vm30_vm0, %v1071_v63, %v1058_v61  ;;  %v1066_v1 = vpop.permute.xlu1 %1065  ;;  %v1376_v61 = vld [vmem:[%s4400_s3 + $0x8] sm:$0xff]  ;;  %v3047_v63 = vld [vmem:[%s4401_s4 + $0x4] ss:$0 sm:$0xff] }
 0x5c7   :  { %v1076_v2 = vsel %vm1075_vm3, %v1073_v0, %v1066_v1 }
 0x5c8   :  { %v1092_v3 = vpop.permute.xlu0 %1091  ;;  %3356 = vmatprep.mubr.msk.f32.mxu1 %vm126_vm1, %v1076_v2 }
 0x5c9   :  { %3354 = vmatprep.subr.mxu1 %v1092_v3 }
 0x5ca   :  { %3355 = vmatpush3.msra.mxu1 %v1092_v3  ;;  %v1068_v26 = vpop.permute.xlu1 %1067 }
 0x5cb   :  { %v1077_v9 = vsel %vm1075_vm3, %v1074_v7, %v1068_v26  ;;  %3370 = vmatprep.subr.mxu1 %v1390_v47 }
 0x5cc   :  { %3357 = vmatmul.mubr.msk.f32.vlgmr.msra.gmra.mxu1 %vm126_vm1, %v1077_v9 }
 0x5cd   :  { %3371 = vmatpush3.msra.mxu1 %v1390_v47 }
 0x5ce   :  { %3372 = vmatprep.subr.mxu1 %v1389_v48 }
 0x5cf   :  { %3373 = vmatpush3.msra.mxu1 %v1389_v48 }
 0x5d0   :  { %3374 = vmatprep.subr.mxu1 %v1388_v50 }
 0x5d1   :  { %3375 = vmatpush3.msra.mxu1 %v1388_v50 }
 0x5d2   :  { %3376 = vmatprep.subr.mxu1 %v1387_v49 }
 0x5d3   :  { %3377 = vmatpush3.msra.mxu1 %v1387_v49  ;;  %v3684_v49 = vmov -1.0  }
 0x5d4   :  { %3378 = vmatprep.subr.mxu1 %v1386_v51 }
 0x5d5   :  { %3379 = vmatpush3.msra.mxu1 %v1386_v51 }
 0x5d6   :  { %3380 = vmatprep.subr.mxu1 %v1385_v52 }
 0x5d7   :  { %3381 = vmatpush3.msra.mxu1 %v1385_v52 }
 0x5d8   :  { %3382 = vmatprep.subr.mxu1 %v1384_v54 }
 0x5d9   :  { %3383 = vmatpush3.msra.mxu1 %v1384_v54 }
 0x5da   :  { %3384 = vmatprep.subr.mxu1 %v1383_v53 }
 0x5db   :  { %3385 = vmatpush3.msra.mxu1 %v1383_v53 }
 0x5dc   :  { %3386 = vmatprep.subr.mxu1 %v1382_v55 }
 0x5dd   :  { %3387 = vmatpush3.msra.mxu1 %v1382_v55 }
 0x5de   :  { %3388 = vmatprep.subr.mxu1 %v1381_v56 }
 0x5df   :  { %3389 = vmatpush3.msra.mxu1 %v1381_v56 }
 0x5e0   :  { %3390 = vmatprep.subr.mxu1 %v1380_v57 }
 0x5e1   :  { %3391 = vmatpush3.msra.mxu1 %v1380_v57 }
 0x5e2   :  { %3392 = vmatprep.subr.mxu1 %v1379_v58 }
 0x5e3   :  { %3393 = vmatpush3.msra.mxu1 %v1379_v58 }
 0x5e4   :  { %3394 = vmatprep.subr.mxu1 %v1378_v59 }
 0x5e5   :  { %3395 = vmatpush3.msra.mxu1 %v1378_v59 }
 0x5e6   :  { %3396 = vmatprep.subr.mxu1 %v1377_v60 }
 0x5e7   :  { %3397 = vmatpush3.msra.mxu1 %v1377_v60 }
 0x5e8   :  { %3398 = vmatprep.subr.mxu1 %v1376_v61 }
 0x5e9   :  { %3399 = vmatpush3.msra.mxu1 %v1376_v61 }
 0x5ea   :  { %3400 = vmatprep.subr.mxu1 %v1375_v62 }
 0x5eb   :  { %3401 = vmatpush3.msra.mxu1 %v1375_v62 }
 0x68c   :  { %v3358_v10 = vpop.f32.mrf.mxu1 }
 0x68d   :  { %v1181_v11 = vadd.f32 %v3358_v10, %v3042_v25 }
 0x68e   :  { %v1175_v12 = vpop.f32.mrf.mxu1 }
 0x68f   :  { %v1176_v13 = vadd.f32 %v3042_v25, %v1175_v12  ;;  %v1185_v16 = vadd.f32 %v1181_v11, %v3768_v15 }
 0x691   :  { %v1191_v17 = vsel %vm126_vm1, %v1185_v16, 0.0  ;;  %v1184_v18 = vadd.f32 %v1176_v13, %v3766_v14  ;;  %v1230_v14 = vld [vmem:[%s4399_s2 + $0x38] sm:$0xff] }
 0x692   :  { %1192 = vadd.xlane.f32.xlu1 %v1191_v17  ;;  %3359 = vmatprep.subr.mxu0 %v1230_v14 }
 0x693   :  { %v1188_v19 = vsel %vm126_vm1, %v1184_v18, 0.0  ;;  %3360 = vmatpush3.msra.mxu0 %v1230_v14 }
 0x694   :  { %1189 = vadd.xlane.f32.xlu0 %v1188_v19  ;;  %3361 = vmatprep.subr.mxu0 %v1229_v29 }
 0x695   :  { %3362 = vmatpush3.msra.mxu0 %v1229_v29 }
 0x696   :  { %3363 = vmatprep.subr.mxu0 %v1228_v30 }
 0x697   :  { %3364 = vmatpush3.msra.mxu0 %v1228_v30 }
 0x698   :  { %3365 = vmatprep.subr.mxu0 %v1227_v31 }
 0x699   :  { %3366 = vmatpush3.msra.mxu0 %v1227_v31 }
 0x71b   :  { %v1193_v20 = vpop.xlane.xlu1 %1192 }
 0x71c   :  { %v1196_v21 = vmul.f32 0.03125, %v1193_v20 }
 0x71d   :  { %v1190_v22 = vpop.xlane.xlu0 %1189 }
 0x71e   :  { %v1195_v23 = vmul.f32 0.03125, %v1190_v22  ;;  %v1198_v4 = vsub.f32 %v1185_v16, %v1196_v21 }
 0x720   :  { %v1197_v24 = vsub.f32 %v1184_v18, %v1195_v23  ;;  %v1200_v28 = vmul.f32 %v1198_v4, %v1198_v4 }
 0x722   :  { %v1199_v27 = vmul.f32 %v1197_v24, %v1197_v24  ;;  %v1204_v15 = vsel %vm126_vm1, %v1200_v28, 0.0 }
 0x724   :  { %v1201_v5 = vsel %vm126_vm1, %v1199_v27, 0.0 }
 0x725   :  { %1202 = vadd.xlane.f32.xlu0 %v1201_v5 }
 0x729   :  { %1205 = vadd.xlane.f32.xlu0 %v1204_v15 }
 0x7ae   :  { %v1203_v32 = vpop.xlane.xlu0 %1202 }
 0x7af   :  { %v1207_v6 = vmul.f32 0.03125, %v1203_v32 }
 0x7b1   :  { %v1209_v33 = vadd.f32 1e-12, %v1207_v6 }
 0x7b2   :  { %v1206_v34 = vpop.xlane.xlu0 %1205 }
 0x7b3   :  { %3585 = vrsqrt.f32 %v1209_v33  ;;  %v1208_v35 = vmul.f32 0.03125, %v1206_v34 }
 0x7b5   :  { %v1210_v36 = vadd.f32 1e-12, %v1208_v35 }
 0x7b7   :  { %3587 = vrsqrt.f32 %v1210_v36 }
 0x7c0   :  { %v3586_v37 = vpop.eup %3585 }
 0x7c1   :  { %v1213_v39 = vmul.f32 %v3586_v37, %v1197_v24 }
 0x7c3   :  { %v1219_v41 = vmul.f32 %v3045_v38, %v1213_v39 }
 0x7c4   :  { %v3588_v42 = vpop.eup %3587 }
 0x7c5   :  { %v1214_v44 = vmul.f32 %v3588_v42, %v1198_v4  ;;  %v3984_v43 = vadd.f32 %v3046_v40, %v1219_v41 }
 0x7c7   :  { %v1220_v45 = vmul.f32 %v3045_v38, %v1214_v44  ;;  %3367 = vmatprep.mubr.msk.f32.mxu0 %vm126_vm1, %v3984_v43 }
 0x7c9   :  { %v3988_v46 = vadd.f32 %v3046_v40, %v1220_v45 }
 0x7cb   :  { %3368 = vmatmul.mubr.msk.f32.vlgmr.msra.gmra.mxu0 %vm126_vm1, %v3988_v46 }
 0x88b   :  { %v3369_v0 = vpop.f32.mrf.mxu0 }
 0x88c   :  { %v1314_v1 = vadd.f32 %v3369_v0, %v3047_v63 }
 0x88d   :  { %v1308_v2 = vpop.f32.mrf.mxu0 }
 0x88e   :  { %v1320_v3 = vmul.f32 0.70710677, %v1314_v1  ;;  %v1309_v8 = vadd.f32 %v3047_v63, %v1308_v2  ;;  %v1318_v60 = vmul.f32 0.5, %v1314_v1  ;;  %v3050_v63 = vld [vmem:[%s4401_s4 + $0x5] ss:$0 sm:$0xff] }
 0x890   :  { %v1326_v7 = vand.u32 2147483647, %v1320_v3  ;;  %v1319_v26 = vmul.f32 0.70710677, %v1309_v8  ;;  %vm1322_vm4 = vcmp.ge.f32.partialorder %v1320_v3, 0.0  ;;  %v1317_v58 = vmul.f32 0.5, %v1309_v8 }
 0x891   :  { %v1324_v51 = vsel %vm1322_vm4, 1.0, %v3684_v49 }
 0x892   :  { %v1328_v9 = vmul.f32 0.3275911, %v1326_v7  ;;  %v1325_v25 = vand.u32 2147483647, %v1319_v26  ;;  %v1358_v13 = vsub.f32 0.0, %v1326_v7  ;;  %vm1321_vm5 = vcmp.ge.f32.partialorder %v1319_v26, 0.0 }
 0x893   :  { %v1323_v55 = vsel %vm1321_vm5, 1.0, %v3684_v49 }
 0x894   :  { %v1330_v10 = vadd.f32 1.0, %v1328_v9  ;;  %v1327_v11 = vmul.f32 0.3275911, %v1325_v25  ;;  %v1357_v18 = vsub.f32 0.0, %v1325_v25  ;;  %v1360_v21 = vmul.f32 %v1358_v13, %v1326_v7 }
 0x896   :  { %3589 = vrcp.f32 %v1330_v10  ;;  %v1329_v12 = vadd.f32 1.0, %v1327_v11  ;;  %v1359_v24 = vmul.f32 %v1357_v18, %v1325_v25  ;;  %v1363_v5 = vmul.f32 1.442695, %v1360_v21  ;;  %v4069_v21 = vld [vmem:[%s4399_s2 + $0x48] sm:$0xff] }
 0x898   :  { %3591 = vrcp.f32 %v1329_v12  ;;  %v1361_v14 = vmul.f32 1.442695, %v1359_v24 }
 0x899   :  { %3593 = vpow2.f32 %v1363_v5 }
 0x89a   :  { %3595 = vpow2.f32 %v1361_v14  ;;  %v3051_v14 = vld [vmem:[%s4401_s4 + $0x6] ss:$0 sm:$0xff] }
 0x8a3   :  { %v3590_v16 = vpop.eup %3589 }
 0x8a4   :  { %v1334_v17 = vmul.f32 %v3590_v16, %v1330_v10 }
 0x8a5   :  { %v3592_v19 = vpop.eup %3591 }
 0x8a6   :  { %v1336_v20 = vsub.f32 2.0, %v1334_v17  ;;  %v1333_v22 = vmul.f32 %v3592_v19, %v1329_v12  ;;  %v3594_v42 = vpop.eup %3593 }
 0x8a7   :  { %v3596_v48 = vpop.eup %3595 }
 0x8a8   :  { %v1338_v23 = vmul.f32 %v3590_v16, %v1336_v20  ;;  %v1335_v4 = vsub.f32 2.0, %v1333_v22  ;;  %v4062_v20 = vld [vmem:[%s4399_s2 + $0x50] sm:$0xff]  ;;  %v4076_v22 = vld [vmem:[%s4399_s2 + $0x40] sm:$0xff] }
 0x8aa   :  { %v1340_v27 = vmul.f32 1.0614054, %v1338_v23  ;;  %v1337_v28 = vmul.f32 %v3592_v19, %v1335_v4 }
 0x8ac   :  { %v1342_v15 = vadd.f32 -1.4531521, %v1340_v27  ;;  %v1339_v29 = vmul.f32 1.0614054, %v1337_v28 }
 0x8ae   :  { %v1344_v30 = vmul.f32 %v1342_v15, %v1338_v23  ;;  %v1341_v31 = vadd.f32 -1.4531521, %v1339_v29 }
 0x8b0   :  { %v1346_v32 = vadd.f32 1.4214138, %v1344_v30  ;;  %v1343_v6 = vmul.f32 %v1341_v31, %v1337_v28 }
 0x8b2   :  { %v1348_v33 = vmul.f32 %v1346_v32, %v1338_v23  ;;  %v1345_v34 = vadd.f32 1.4214138, %v1343_v6  ;;  %v3052_v6 = vld [vmem:[%s4401_s4 + $0x7] ss:$0 sm:$0xff] }
 0x8b4   :  { %v1350_v35 = vadd.f32 -0.28449672, %v1348_v33  ;;  %v1347_v36 = vmul.f32 %v1345_v34, %v1337_v28 }
 0x8b6   :  { %v1352_v37 = vmul.f32 %v1350_v35, %v1338_v23  ;;  %v1349_v38 = vadd.f32 -0.28449672, %v1347_v36  ;;  %v3058_v36 = vld [vmem:[%s4401_s4 + $0x8] ss:$0 sm:$0xff] }
 0x8b8   :  { %v1354_v39 = vadd.f32 0.2548296, %v1352_v37  ;;  %v1351_v40 = vmul.f32 %v1349_v38, %v1337_v28 }
 0x8ba   :  { %v1356_v41 = vmul.f32 %v1354_v39, %v1338_v23  ;;  %v1353_v44 = vadd.f32 0.2548296, %v1351_v40 }
 0x8bc   :  { %v1366_v45 = vmul.f32 %v3594_v42, %v1356_v41  ;;  %v1355_v47 = vmul.f32 %v1353_v44, %v1337_v28 }
 0x8be   :  { %v1368_v50 = vsub.f32 1.0, %v1366_v45  ;;  %v1365_v52 = vmul.f32 %v3596_v48, %v1355_v47 }
 0x8c0   :  { %v1370_v54 = vmul.f32 %v1368_v50, %v1324_v51  ;;  %v1367_v53 = vsub.f32 1.0, %v1365_v52 }
 0x8c2   :  { %v1369_v56 = vmul.f32 %v1367_v53, %v1323_v55  ;;  %v1372_v57 = vadd.f32 1.0, %v1370_v54 }
 0x8c4   :  { %v1371_v59 = vadd.f32 1.0, %v1369_v56  ;;  %v1374_v62 = vmul.f32 %v1372_v57, %v1318_v60 }
 0x8c6   :  { %v1373_v61 = vmul.f32 %v1371_v59, %v1317_v58 }
 0x8c8   :  { %3402 = vmatprep.mubr.f32.mxu1 %v1373_v61 }
 0x8c9   :  { %3403 = vmatmul.mubr.f32.vlgmr.msra.gmra.mxu1 %v1374_v62  ;;  %v3651_v62 = vld [vmem:[%s4398_s1 + $0x42] sm:$0xff] }
 0x989   :  { %v3404_v0 = vpop.f32.mrf.mxu1 }
 0x98a   :  { %v1468_v2 = vadd.f32 %v3404_v0, %v3050_v63 }
 0x98b   :  { %v1462_v3 = vpop.f32.mrf.mxu1 }
 0x98c   :  { %v1463_v7 = vadd.f32 %v3050_v63, %v1462_v3  ;;  %v1472_v26 = vadd.f32 %v1468_v2, %v3988_v46  ;;  %v3652_v2 = vld [vmem:[%s4398_s1 + $0x3a] sm:$0xff] }
 0x98e   :  { %v1478_v9 = vsel %vm126_vm1, %v1472_v26, 0.0  ;;  %v1471_v8 = vadd.f32 %v1463_v7, %v3984_v43  ;;  %v4057_v43 = vld [vmem:[%s4399_s2 + $0x58] sm:$0xff] }
 0x98f   :  { %1479 = vadd.xlane.f32.xlu0 %v1478_v9  ;;  %3405 = vmatprep.subr.mxu0 %v4057_v43 }
 0x990   :  { %v1475_v1 = vsel %vm126_vm1, %v1471_v8, 0.0  ;;  %3406 = vmatpush3.msra.mxu0 %v4057_v43 }
 0x991   :  { %1476 = vadd.xlane.f32.xlu1 %v1475_v1  ;;  %3407 = vmatprep.subr.mxu0 %v4062_v20 }
 0x992   :  { %3408 = vmatpush3.msra.mxu0 %v4062_v20 }
 0x993   :  { %3409 = vmatprep.subr.mxu0 %v4069_v21 }
 0x994   :  { %3410 = vmatpush3.msra.mxu0 %v4069_v21 }
 0x995   :  { %3411 = vmatprep.subr.mxu0 %v4076_v22 }
 0x996   :  { %3412 = vmatpush3.msra.mxu0 %v4076_v22 }
 0xa18   :  { %v1480_v25 = vpop.xlane.xlu0 %1479 }
 0xa19   :  { %v1482_v10 = vmul.f32 0.03125, %v1480_v25 }
 0xa1a   :  { %v1477_v11 = vpop.xlane.xlu1 %1476 }
 0xa1b   :  { %v1484_v12 = vsub.f32 %v1472_v26, %v1482_v10  ;;  %v1481_v13 = vmul.f32 0.03125, %v1477_v11 }
 0xa1d   :  { %v1483_v16 = vsub.f32 %v1471_v8, %v1481_v13  ;;  %v1486_v17 = vmul.f32 %v1484_v12, %v1484_v12 }
 0xa1f   :  { %v1490_v18 = vsel %vm126_vm1, %v1486_v17, 0.0  ;;  %v1485_v19 = vmul.f32 %v1483_v16, %v1483_v16 }
 0xa20   :  { %1491 = vadd.xlane.f32.xlu0 %v1490_v18 }
 0xa21   :  { %v1487_v46 = vsel %vm126_vm1, %v1485_v19, 0.0 }
 0xa22   :  { %1488 = vadd.xlane.f32.xlu1 %v1487_v46 }
 0xaa9   :  { %v1492_v23 = vpop.xlane.xlu0 %1491 }
 0xaaa   :  { %v1494_v4 = vmul.f32 0.03125, %v1492_v23 }
 0xaab   :  { %v1489_v24 = vpop.xlane.xlu1 %1488 }
 0xaac   :  { %v1496_v27 = vadd.f32 1e-12, %v1494_v4  ;;  %v1493_v5 = vmul.f32 0.03125, %v1489_v24 }
 0xaae   :  { %3597 = vrsqrt.f32 %v1496_v27  ;;  %v1495_v28 = vadd.f32 1e-12, %v1493_v5 }
 0xab0   :  { %3599 = vrsqrt.f32 %v1495_v28 }
 0xabb   :  { %v3598_v15 = vpop.eup %3597 }
 0xabc   :  { %v1500_v29 = vmul.f32 %v3598_v15, %v1484_v12 }
 0xabd   :  { %v3600_v30 = vpop.eup %3599 }
 0xabe   :  { %v1499_v31 = vmul.f32 %v3600_v30, %v1483_v16  ;;  %v1506_v32 = vmul.f32 %v3051_v14, %v1500_v29 }
 0xac0   :  { %v1505_v33 = vmul.f32 %v3051_v14, %v1499_v31  ;;  %v4090_v35 = vadd.f32 %v3052_v6, %v1506_v32 }
 0xac2   :  { %v4088_v34 = vadd.f32 %v3052_v6, %v1505_v33 }
 0xac4   :  { %3413 = vmatprep.mubr.msk.f32.mxu0 %vm126_vm1, %v4088_v34 }
 0xac5   :  { %3414 = vmatmul.mubr.msk.f32.vlgmr.msra.gmra.mxu0 %vm126_vm1, %v4090_v35 }
 0xb85   :  { %v3415_v37 = vpop.f32.mrf.mxu0 }
 0xb86   :  { %v4099_v38 = vadd.f32 %v3415_v37, %v3058_v36 }
 0xb87   :  { %v1596_v39 = vpop.f32.mrf.mxu0 }
 0xb88   :  { %v4101_v40 = vadd.f32 %v3058_v36, %v1596_v39  ;;  %1609 = vrot.lane.b32.xlu1 %v4099_v38, %s3676_s15 }
 0xb8a   :  { %1607 = vrot.lane.b32.xlu0 %v4101_v40, %s3676_s15  ;;  %3420 = vmatprep.mubr.msk.f32.mxu0 %vm226_vm2, %v4101_v40 }
 0xb8c   :  { %1613 = vrot.lane.b32.xlu1 %v4099_v38, %s3675_s14 }
 0xb8e   :  { %1611 = vrot.lane.b32.xlu0 %v4101_v40, %s3675_s14 }
 0xb90   :  { %1617 = vrot.lane.b32.xlu1 %v4099_v38, %s3677_s16 }
 0xb92   :  { %1621 = vrot.lane.b32.xlu0 %v4099_v38, %s3678_s17 }
 0xb94   :  { %1615 = vrot.lane.b32.xlu1 %v4101_v40, %s3677_s16 }
 0xb98   :  { %1619 = vrot.lane.b32.xlu1 %v4101_v40, %s3678_s17 }
 0xbfa   :  { %v4121_v41 = vpop.permute.xlu1 %1609 }
 0xbfb   :  { %1708 = vrot.lane.b32.xlu0 %v4121_v41, %s3678_s17 }
 0xbfc   :  { %v4125_v42 = vpop.permute.xlu0 %1607 }
 0xbfd   :  { %1706 = vrot.lane.b32.xlu1 %v4125_v42, %s3678_s17 }
 0xbfe   :  { %v4129_v44 = vpop.permute.xlu1 %1613 }
 0xbff   :  { %1795 = vrot.lane.b32.xlu0 %v4129_v44, %s3678_s17 }
 0xc00   :  { %v4133_v45 = vpop.permute.xlu0 %1611 }
 0xc02   :  { %v4135_v47 = vpop.permute.xlu1 %1617 }
 0xc03   :  { %1882 = vrot.lane.b32.xlu1 %v4135_v47, %s3678_s17  ;;  %1793 = vrot.lane.b32.xlu0 %v4133_v45, %s3678_s17 }
 0xc04   :  { %v1622_v48 = vpop.permute.xlu0 %1621 }
 0xc05   :  { %3416 = vmatprep.subr.msk.mxu0 %vm226_vm2, %v1622_v48 }
 0xc06   :  { %v4142_v50 = vpop.permute.xlu1 %1615  ;;  %3417 = vmatpush3.xpose.msk.msra.mxu0 %vm226_vm2, %v1622_v48 }
 0xc07   :  { %3441 = vmatprep.mubr.msk.f32.mxu1 %vm226_vm2, %v4142_v50  ;;  %1880 = vrot.lane.b32.xlu1 %v4142_v50, %s3678_s17 }
 0xc0a   :  { %v1620_v51 = vpop.permute.xlu1 %1619 }
 0xc0b   :  { %3418 = vmatprep.subr.msk.mxu0 %vm226_vm2, %v1620_v51 }
 0xc0c   :  { %3419 = vmatpush3.xpose.msk.msra.mxu0 %vm226_vm2, %v1620_v51 }
 0xc0f   :  { %3421 = vmatmul.mubr.msk.f32.vlgmr.msra.gmra.mxu0 %vm226_vm2, %v4099_v38 }
 0xc10   :  { %3427 = vmatprep.mubr.msk.f32.mxu0 %vm226_vm2, %v4125_v42 }
 0xc6d   :  { %v1709_v52 = vpop.permute.xlu0 %1708 }
 0xc6e   :  { %3423 = vmatprep.subr.msk.mxu0 %vm226_vm2, %v1709_v52 }
 0xc6f   :  { %v1707_v54 = vpop.permute.xlu1 %1706  ;;  %3424 = vmatpush3.xpose.msk.msra.mxu0 %vm226_vm2, %v1709_v52 }
 0xc70   :  { %3425 = vmatprep.subr.msk.mxu0 %vm226_vm2, %v1707_v54 }
 0xc71   :  { %v1796_v53 = vpop.permute.xlu0 %1795 }
 0xc73   :  { %3426 = vmatpush3.xpose.msk.msra.mxu0 %vm226_vm2, %v1707_v54 }
 0xc74   :  { %3430 = vmatprep.subr.msk.mxu0 %vm226_vm2, %v1796_v53 }
 0xc75   :  { %v1883_v55 = vpop.permute.xlu1 %1882  ;;  %v1794_v56 = vpop.permute.xlu0 %1793 }
 0xc76   :  { %3428 = vmatmul.mubr.msk.f32.vlgmr.msra.gmra.mxu0 %vm226_vm2, %v4121_v41  ;;  %3437 = vmatprep.subr.msk.mxu1 %vm226_vm2, %v1883_v55 }
 0xc77   :  { %3431 = vmatpush3.xpose.msk.msra.mxu0 %vm226_vm2, %v1796_v53  ;;  %3434 = vmatprep.mubr.msk.f32.mxu0 %vm226_vm2, %v4133_v45 }
 0xc78   :  { %3438 = vmatpush3.xpose.msk.msra.mxu1 %vm226_vm2, %v1883_v55  ;;  %3432 = vmatprep.subr.msk.mxu0 %vm226_vm2, %v1794_v56 }
 0xc79   :  { %v1881_v57 = vpop.permute.xlu1 %1880 }
 0xc7a   :  { %3439 = vmatprep.subr.msk.mxu1 %vm226_vm2, %v1881_v57 }
 0xc7b   :  { %3433 = vmatpush3.xpose.msk.msra.mxu0 %vm226_vm2, %v1794_v56 }
 0xc7c   :  { %3440 = vmatpush3.xpose.msk.msra.mxu1 %vm226_vm2, %v1881_v57 }
 0xc7e   :  { %3435 = vmatmul.mubr.msk.f32.vlgmr.msra.gmra.mxu0 %vm226_vm2, %v4129_v44 }
 0xc7f   :  { %3442 = vmatmul.mubr.msk.f32.vlgmr.msra.gmra.mxu1 %vm226_vm2, %v4135_v47 }
 0xccf   :  { %v3422_v58 = vpop.f32.mrf.mxu0 }
 0xcd0   :  { %v1968_v59 = vmul.f32 0.35355338, %v3422_v58 }
 0xcd1   :  { %v1697_v60 = vpop.f32.mrf.mxu0 }
 0xcd2   :  { %v1967_v61 = vmul.f32 0.35355338, %v1697_v60  ;;  %v1976_v63 = vadd.f32 %v3651_v62, %v1968_v59 }
 0xcd4   :  { %v1986_v0 = vsel %vm30_vm0, %v1976_v63, -inf  ;;  %v1975_v3 = vadd.f32 %v3652_v2, %v1967_v61 }
 0xcd5   :  { %1987 = vmax.xlane.f32.xlu1 %v1986_v0 }
 0xcd6   :  { %v1983_v7 = vsel %vm30_vm0, %v1975_v3, -inf }
 0xcd7   :  { %1984 = vmax.xlane.f32.xlu0 %v1983_v7 }
 0xd36   :  { %v3429_v26 = vpop.f32.mrf.mxu0 }
 0xd37   :  { %v1970_v9 = vmul.f32 0.35355338, %v3429_v26 }
 0xd38   :  { %v1784_v8 = vpop.f32.mrf.mxu0 }
 0xd39   :  { %v1969_v1 = vmul.f32 0.35355338, %v1784_v8  ;;  %v1978_v25 = vadd.f32 %v3651_v62, %v1970_v9 }
 0xd3b   :  { %v1992_v10 = vsel %vm30_vm0, %v1978_v25, -inf  ;;  %v1977_v11 = vadd.f32 %v3652_v2, %v1969_v1 }
 0xd3c   :  { %1993 = vmax.xlane.f32.xlu0 %v1992_v10 }
 0xd3d   :  { %v1989_v17 = vsel %vm30_vm0, %v1977_v11, -inf }
 0xd3e   :  { %v3436_v12 = vpop.f32.mrf.mxu0 }
 0xd3f   :  { %v1972_v13 = vmul.f32 0.35355338, %v3436_v12  ;;  %v3443_v16 = vpop.f32.mrf.mxu1 }
 0xd40   :  { %v1974_v18 = vmul.f32 0.35355338, %v3443_v16  ;;  %1990 = vmax.xlane.f32.xlu0 %v1989_v17  ;;  %v1871_v30 = vpop.f32.mrf.mxu0 }
 0xd41   :  { %v1958_v19 = vpop.f32.mrf.mxu1  ;;  %v1980_v46 = vadd.f32 %v3651_v62, %v1972_v13  ;;  %v1971_v31 = vmul.f32 0.35355338, %v1871_v30 }
 0xd42   :  { %v1973_v23 = vmul.f32 0.35355338, %v1958_v19  ;;  %v1982_v24 = vadd.f32 %v3651_v62, %v1974_v18 }
 0xd43   :  { %v1998_v4 = vsel %vm30_vm0, %v1980_v46, -inf  ;;  %v1979_v6 = vadd.f32 %v3652_v2, %v1971_v31 }
 0xd44   :  { %1999 = vmax.xlane.f32.xlu0 %v1998_v4  ;;  %v1981_v27 = vadd.f32 %v3652_v2, %v1973_v23  ;;  %v2004_v28 = vsel %vm30_vm0, %v1982_v24, -inf }
 0xd45   :  { %v1995_v36 = vsel %vm30_vm0, %v1979_v6, -inf }
 0xd46   :  { %v2001_v5 = vsel %vm30_vm0, %v1981_v27, -inf }
 0xd47   :  { %2002 = vmax.xlane.f32.xlu1 %v2001_v5 }
 0xd48   :  { %2005 = vmax.xlane.f32.xlu0 %v2004_v28 }
 0xd58   :  { %2097 = vrot.lane.b32.xlu1 %v4099_v38, %s3679_s22 }
 0xd5c   :  { %2184 = vrot.lane.b32.xlu1 %v4121_v41, %s3679_s22 }
 0xd5e   :  { %2095 = vrot.lane.b32.xlu0 %v4101_v40, %s3679_s22  ;;  %v1988_v15 = vpop.xlane.xlu1 %1987 }
 0xd5f   :  { %v2008_v14 = vsub.f32 %v1976_v63, %v1988_v15 }
 0xd60   :  { %v1985_v37 = vpop.xlane.xlu0 %1984 }
 0xd61   :  { %v2017_v29 = vmul.f32 1.442695, %v2008_v14  ;;  %v2007_v38 = vsub.f32 %v1975_v3, %v1985_v37 }
 0xd63   :  { %3601 = vpow2.f32 %v2017_v29  ;;  %v2015_v39 = vmul.f32 1.442695, %v2007_v38 }
 0xd65   :  { %3603 = vpow2.f32 %v2015_v39 }
 0xd70   :  { %v4194_v32 = vpop.eup %3601 }
 0xd71   :  { %v2034_v33 = vsel %vm30_vm0, %v4194_v32, 0.0 }
 0xd72   :  { %v4201_v40 = vpop.eup %3603 }
 0xd73   :  { %v2031_v41 = vsel %vm30_vm0, %v4201_v40, 0.0 }
 0xd7d   :  { %2035 = vadd.xlane.f32.xlu0 %v2034_v33 }
 0xd80   :  { %1996 = vmax.xlane.f32.xlu1 %v1995_v36 }
 0xd91   :  { %2182 = vrot.lane.b32.xlu1 %v4125_v42, %s3679_s22 }
 0xdb5   :  { %2032 = vadd.xlane.f32.xlu1 %v2031_v41 }
 0xdc5   :  { %v1994_v48 = vpop.xlane.xlu0 %1993 }
 0xdc6   :  { %v2010_v51 = vsub.f32 %v1978_v25, %v1994_v48 }
 0xdc8   :  { %v2021_v52 = vmul.f32 1.442695, %v2010_v51 }
 0xdc9   :  { %v1991_v54 = vpop.xlane.xlu0 %1990 }
 0xdca   :  { %3605 = vpow2.f32 %v2021_v52  ;;  %v2009_v53 = vsub.f32 %v1977_v11, %v1991_v54 }
 0xdcc   :  { %v2019_v55 = vmul.f32 1.442695, %v2009_v53 }
 0xdcd   :  { %v2000_v56 = vpop.xlane.xlu0 %1999 }
 0xdce   :  { %3607 = vpow2.f32 %v2019_v55  ;;  %v2012_v42 = vsub.f32 %v1980_v46, %v2000_v56 }
 0xdd0   :  { %v2003_v57 = vpop.xlane.xlu1 %2002  ;;  %v2025_v62 = vmul.f32 1.442695, %v2012_v42 }
 0xdd1   :  { %v2013_v58 = vsub.f32 %v1981_v27, %v2003_v57  ;;  %v2006_v59 = vpop.xlane.xlu0 %2005 }
 0xdd2   :  { %v2014_v60 = vsub.f32 %v1982_v24, %v2006_v59 }
 0xdd3   :  { %v2027_v61 = vmul.f32 1.442695, %v2013_v58 }
 0xdd4   :  { %v2029_v63 = vmul.f32 1.442695, %v2014_v60  ;;  %v2098_v0 = vpop.permute.xlu1 %2097 }
 0xdd5   :  { %3609 = vpow2.f32 %v2027_v61  ;;  %3444 = vmatprep.subr.mxu0 %v2098_v0  ;;  %v2096_v2 = vpop.permute.xlu0 %2095 }
 0xdd6   :  { %3611 = vpow2.f32 %v2029_v63  ;;  %3445 = vmatpush3.msra.mxu0 %v2098_v0 }
 0xdd7   :  { %v4205_v3 = vpop.eup %3605  ;;  %3446 = vmatprep.subr.mxu0 %v2096_v2  ;;  %3613 = vpow2.f32 %v2025_v62 }
 0xdd8   :  { %v2185_v7 = vpop.permute.xlu1 %2184  ;;  %3447 = vmatpush3.msra.mxu0 %v2096_v2  ;;  %v2040_v26 = vsel %vm30_vm0, %v4205_v3, 0.0 }
 0xdd9   :  { %3451 = vmatprep.subr.mxu0 %v2185_v7  ;;  %2041 = vadd.xlane.f32.xlu0 %v2040_v26 }
 0xddb   :  { %v4209_v9 = vpop.eup %3607 }
 0xddc   :  { %v2037_v8 = vsel %vm30_vm0, %v4209_v9, 0.0 }
 0xddd   :  { %2038 = vadd.xlane.f32.xlu1 %v2037_v8 }
 0xde2   :  { %v4213_v1 = vpop.eup %3609 }
 0xde3   :  { %v4215_v25 = vpop.eup %3611  ;;  %v2049_v10 = vsel %vm30_vm0, %v4213_v1, 0.0 }
 0xde4   :  { %2050 = vadd.xlane.f32.xlu1 %v2049_v10  ;;  %v2052_v11 = vsel %vm30_vm0, %v4215_v25, 0.0  ;;  %v4221_v12 = vpop.eup %3613 }
 0xde5   :  { %2053 = vadd.xlane.f32.xlu0 %v2052_v11  ;;  %v2046_v13 = vsel %vm30_vm0, %v4221_v12, 0.0 }
 0xde9   :  { %2047 = vadd.xlane.f32.xlu0 %v2046_v13 }
 0xdf5   :  { %2358 = vrot.lane.b32.xlu1 %v4135_v47, %s3679_s22 }
 0xdff   :  { %2271 = vrot.lane.b32.xlu0 %v4129_v44, %s3679_s22 }
 0xe03   :  { %2269 = vrot.lane.b32.xlu0 %v4133_v45, %s3679_s22 }
 0xe06   :  { %v2036_v44 = vpop.xlane.xlu0 %2035 }
 0xe07   :  { %2492 = vrot.lane.b32.xlu0 %v4057_v43, %s3680_s23 }
 0xe09   :  { %v1997_v16 = vpop.xlane.xlu1 %1996 }
 0xe0a   :  { %v2011_v17 = vsub.f32 %v1979_v6, %v1997_v16 }
 0xe0c   :  { %v2023_v18 = vmul.f32 1.442695, %v2011_v17 }
 0xe0d   :  { %v2183_v43 = vpop.permute.xlu1 %2182 }
 0xe0e   :  { %3615 = vpow2.f32 %v2023_v18 }
 0xe0f   :  { %3617 = vrcp.f32 %v2036_v44 }
 0xe1b   :  { %v4233_v19 = vpop.eup %3615 }
 0xe1c   :  { %v2043_v46 = vsel %vm30_vm0, %v4233_v19, 0.0  ;;  %v3618_v47 = vpop.eup %3617 }
 0xe1d   :  { %2044 = vadd.xlane.f32.xlu1 %v2043_v46  ;;  %v2064_v23 = vmul.f32 %v3618_v47, %v2036_v44 }
 0xe1f   :  { %v2072_v24 = vsub.f32 2.0, %v2064_v23 }
 0xe21   :  { %v2080_v28 = vmul.f32 %v3618_v47, %v2072_v24 }
 0xe2e   :  { %2356 = vrot.lane.b32.xlu1 %v4142_v50, %s3679_s22 }
 0xe32   :  { %2490 = vrot.lane.b32.xlu1 %v4062_v20, %s3680_s23  ;;  %v2088_v20 = vmul.f32 %v4194_v32, %v2080_v28 }
 0xe36   :  { %2488 = vrot.lane.b32.xlu1 %v4069_v21, %s3680_s23 }
 0xe3e   :  { %v2033_v45 = vpop.xlane.xlu1 %2032 }
 0xe3f   :  { %3619 = vrcp.f32 %v2033_v45 }
 0xe4c   :  { %v3620_v4 = vpop.eup %3619 }
 0xe4d   :  { %v2063_v27 = vmul.f32 %v3620_v4, %v2033_v45 }
 0xe4f   :  { %v2071_v5 = vsub.f32 2.0, %v2063_v27 }
 0xe51   :  { %v2079_v15 = vmul.f32 %v3620_v4, %v2071_v5 }
 0xe53   :  { %v2087_v50 = vmul.f32 %v4201_v40, %v2079_v15 }
 0xe55   :  { %3448 = vmatprep.mubr.msk.f32.mxu0 %vm30_vm0, %v2087_v50 }
 0xe56   :  { %3449 = vmatmul.mubr.msk.f32.vlgmr.msra.gmra.mxu0 %vm30_vm0, %v2088_v20 }
 0xe57   :  { %3452 = vmatpush3.msra.mxu0 %v2185_v7 }
 0xe58   :  { %3453 = vmatprep.subr.mxu0 %v2183_v43 }
 0xe59   :  { %3454 = vmatpush3.msra.mxu0 %v2183_v43 }
 0xe62   :  { %v2042_v21 = vpop.xlane.xlu0 %2041 }
 0xe63   :  { %3621 = vrcp.f32 %v2042_v21 }
 0xe66   :  { %v2039_v14 = vpop.xlane.xlu1 %2038 }
 0xe67   :  { %3623 = vrcp.f32 %v2039_v14 }
 0xe6d   :  { %v2051_v29 = vpop.xlane.xlu1 %2050 }
 0xe6e   :  { %3625 = vrcp.f32 %v2051_v29  ;;  %v2054_v30 = vpop.xlane.xlu0 %2053 }
 0xe6f   :  { %3627 = vrcp.f32 %v2054_v30 }
 0xe70   :  { %v3622_v31 = vpop.eup %3621 }
 0xe71   :  { %v2066_v6 = vmul.f32 %v3622_v31, %v2042_v21  ;;  %v2359_v33 = vpop.permute.xlu1 %2358 }
 0xe72   :  { %3465 = vmatprep.subr.mxu0 %v2359_v33  ;;  %v2048_v36 = vpop.xlane.xlu0 %2047 }
 0xe73   :  { %v2074_v37 = vsub.f32 2.0, %v2066_v6  ;;  %3629 = vrcp.f32 %v2048_v36 }
 0xe74   :  { %v3624_v32 = vpop.eup %3623 }
 0xe75   :  { %v2065_v38 = vmul.f32 %v3624_v32, %v2039_v14  ;;  %v2082_v41 = vmul.f32 %v3622_v31, %v2074_v37 }
 0xe76   :  { %v2272_v39 = vpop.permute.xlu0 %2271 }
 0xe77   :  { %v2073_v40 = vsub.f32 2.0, %v2065_v38  ;;  %3458 = vmatprep.subr.mxu1 %v2272_v39  ;;  %v2090_v53 = vmul.f32 %v4205_v3, %v2082_v41 }
 0xe78   :  { %3459 = vmatpush3.msra.mxu1 %v2272_v39 }
 0xe79   :  { %v2081_v48 = vmul.f32 %v3624_v32, %v2073_v40 }
 0xe7a   :  { %v2270_v51 = vpop.permute.xlu0 %2269 }
 0xe7b   :  { %v3626_v52 = vpop.eup %3625  ;;  %v2089_v54 = vmul.f32 %v4209_v9, %v2081_v48  ;;  %3460 = vmatprep.subr.mxu1 %v2270_v51 }
 0xe7c   :  { %v2069_v55 = vmul.f32 %v3626_v52, %v2051_v29  ;;  %3461 = vmatpush3.msra.mxu1 %v2270_v51  ;;  %v3628_v58 = vpop.eup %3627 }
 0xe7d   :  { %3455 = vmatprep.mubr.msk.f32.mxu0 %vm30_vm0, %v2089_v54  ;;  %v2070_v59 = vmul.f32 %v3628_v58, %v2054_v30  ;;  %v3090_v30 = vld [vmem:[%s4401_s4 + $0x9] ss:$0 sm:$0xff] }
 0xe7e   :  { %v2077_v56 = vsub.f32 2.0, %v2069_v55  ;;  %3456 = vmatmul.mubr.msk.f32.vlgmr.msra.gmra.mxu0 %vm30_vm0, %v2090_v53 }
 0xe7f   :  { %3466 = vmatpush3.msra.mxu0 %v2359_v33  ;;  %v2078_v60 = vsub.f32 2.0, %v2070_v59 }
 0xe80   :  { %v2085_v42 = vmul.f32 %v3626_v52, %v2077_v56  ;;  %v3630_v2 = vpop.eup %3629 }
 0xe81   :  { %v2086_v62 = vmul.f32 %v3628_v58, %v2078_v60  ;;  %v2068_v3 = vmul.f32 %v3630_v2, %v2048_v36  ;;  %v3097_v58 = vld [vmem:[%s4399_s2 + $0x60] sm:$0xff] }
 0xe82   :  { %v2093_v57 = vmul.f32 %v4213_v1, %v2085_v42  ;;  %v3099_v42 = vld [vmem:[%s4399_s2 + $0x70] sm:$0xff] }
 0xe83   :  { %v2094_v0 = vmul.f32 %v4215_v25, %v2086_v62  ;;  %v2076_v26 = vsub.f32 2.0, %v2068_v3  ;;  %v2493_v25 = vpop.permute.xlu0 %2492  ;;  %v3095_v3 = vld [vmem:[%s4401_s4 + $0xa] ss:$0 sm:$0xff] }
 0xe84   :  { %3469 = vmatprep.mubr.msk.f32.mxu0 %vm30_vm0, %v2093_v57  ;;  %3472 = vmatprep.subr.mxu1 %v2493_v25  ;;  %v3098_v57 = vld [vmem:[%s4399_s2 + $0x68] sm:$0xff] }
 0xe85   :  { %v2084_v1 = vmul.f32 %v3630_v2, %v2076_v26  ;;  %v3096_v26 = vld [vmem:[%s4401_s4 + $0xb] ss:$0 sm:$0xff] }
 0xe87   :  { %v2092_v13 = vmul.f32 %v4221_v12, %v2084_v1 }
 0xea6   :  { %v2045_v61 = vpop.xlane.xlu1 %2044 }
 0xea7   :  { %3631 = vrcp.f32 %v2045_v61 }
 0xeaa   :  { %v2357_v63 = vpop.permute.xlu1 %2356 }
 0xeab   :  { %3467 = vmatprep.subr.mxu0 %v2357_v63 }
 0xeac   :  { %3468 = vmatpush3.msra.mxu0 %v2357_v63 }
 0xead   :  { %3470 = vmatmul.mubr.msk.f32.vlgmr.msra.gmra.mxu0 %vm30_vm0, %v2094_v0 }
 0xeae   :  { %v2491_v16 = vpop.permute.xlu1 %2490 }
 0xeb2   :  { %v2489_v18 = vpop.permute.xlu1 %2488 }
 0xeb4   :  { %v3632_v7 = vpop.eup %3631 }
 0xeb5   :  { %v2067_v9 = vmul.f32 %v3632_v7, %v2045_v61 }
 0xeb7   :  { %v2075_v8 = vsub.f32 2.0, %v2067_v9 }
 0xeb9   :  { %v2083_v10 = vmul.f32 %v3632_v7, %v2075_v8 }
 0xebb   :  { %v2091_v11 = vmul.f32 %v4233_v19, %v2083_v10 }
 0xebd   :  { %3462 = vmatprep.mubr.msk.f32.mxu1 %vm30_vm0, %v2091_v11 }
 0xebe   :  { %3463 = vmatmul.mubr.msk.f32.vlgmr.msra.gmra.mxu1 %vm30_vm0, %v2092_v13 }
 0xebf   :  { %3473 = vmatpush3.msra.mxu1 %v2493_v25  ;;  %v3120_v25 = vld [vmem:[%s4400_s3 + $0xf8] sm:$0xff] }
 0xec0   :  { %3474 = vmatprep.subr.mxu1 %v2491_v16 }
 0xec1   :  { %3475 = vmatpush3.msra.mxu1 %v2491_v16  ;;  %v3119_v16 = vld [vmem:[%s4400_s3 + $0xf0] sm:$0xff] }
 0xec2   :  { %3476 = vmatprep.subr.mxu1 %v2489_v18 }
 0xec3   :  { %3477 = vmatpush3.msra.mxu1 %v2489_v18  ;;  %v3117_v18 = vld [vmem:[%s4400_s3 + $0xe0] sm:$0xff] }
 0xf16   :  { %v3450_v17 = vpop.f32.mrf.mxu0 }
 0xf18   :  { %v2173_v46 = vpop.f32.mrf.mxu0 }
 0xf3e   :  { %v3457_v44 = vpop.f32.mrf.mxu0 }
 0xf3f   :  { %2447 = vrot.lane.b32.xlu0 %v3457_v44, %s3681_s24  ;;  %v3115_v44 = vld [vmem:[%s4400_s3 + $0xd0] sm:$0xff] }
 0xf40   :  { %v2260_v19 = vpop.f32.mrf.mxu0 }
 0xf43   :  { %2445 = vrot.lane.b32.xlu0 %v2260_v19, %s3681_s24  ;;  %v3114_v19 = vld [vmem:[%s4400_s3 + $0xc8] sm:$0xff] }
 0xf6d   :  { %v3471_v12 = vpop.f32.mrf.mxu0 }
 0xf6f   :  { %v2434_v43 = vpop.f32.mrf.mxu0 }
 0xf70   :  { %2461 = vrot.lane.b32.xlu1 %v2434_v43, %s3683_s26  ;;  %v3112_v43 = vld [vmem:[%s4400_s3 + $0xb8] sm:$0xff] }
 0xf7e   :  { %v3464_v45 = vpop.f32.mrf.mxu1 }
 0xf7f   :  { %2455 = vrot.lane.b32.xlu0 %v3464_v45, %s3682_s25  ;;  %v3111_v45 = vld [vmem:[%s4400_s3 + $0xb0] sm:$0xff] }
 0xf80   :  { %v2347_v47 = vpop.f32.mrf.mxu1 }
 0xf81   :  { %2453 = vrot.lane.b32.xlu1 %v2347_v47, %s3682_s25  ;;  %v3110_v47 = vld [vmem:[%s4400_s3 + $0xa8] sm:$0xff] }
 0xf83   :  { %2486 = vrot.lane.b32.xlu0 %v4076_v22, %s3680_s23 }
 0xf85   :  { %2463 = vrot.lane.b32.xlu1 %v3471_v12, %s3683_s26  ;;  %v3113_v12 = vld [vmem:[%s4400_s3 + $0xc0] sm:$0xff] }
 0xfb1   :  { %v2448_v23 = vpop.permute.xlu0 %2447 }
 0xfb2   :  { %v2468_v21 = vsel %vm226_vm2, %v3450_v17, %v2448_v23  ;;  %v3118_v17 = vld [vmem:[%s4400_s3 + $0xe8] sm:$0xff]  ;;  %v3109_v23 = vld [vmem:[%s4400_s3 + $0xa0] sm:$0xff] }
 0xfb5   :  { %v2446_v4 = vpop.permute.xlu0 %2445 }
 0xfb6   :  { %v2467_v5 = vsel %vm226_vm2, %v2173_v46, %v2446_v4  ;;  %v3116_v46 = vld [vmem:[%s4400_s3 + $0xd8] sm:$0xff] }
 0xfb7   :  { %v3108_v4 = vld [vmem:[%s4400_s3 + $0x98] sm:$0xff] }
 0xfe2   :  { %v2462_v24 = vpop.permute.xlu1 %2461 }
 0xff1   :  { %v2456_v27 = vpop.permute.xlu0 %2455 }
 0xff2   :  { %v2470_v22 = vsel %vm30_vm0, %v2468_v21, %v2456_v27  ;;  %v3106_v27 = vld [vmem:[%s4400_s3 + $0x88] sm:$0xff] }
 0xff3   :  { %v2454_v28 = vpop.permute.xlu1 %2453 }
 0xff4   :  { %v2469_v15 = vsel %vm30_vm0, %v2467_v5, %v2454_v28  ;;  %v3105_v5 = vld [vmem:[%s4400_s3 + $0x80] sm:$0xff]  ;;  %v3102_v28 = vld [vmem:[%s4401_s4 + $0xc] ss:$0 sm:$0xff] }
 0xff5   :  { %v2487_v50 = vpop.permute.xlu0 %2486  ;;  %v2471_v20 = vsel %vm1075_vm3, %v2469_v15, %v2462_v24  ;;  %v3107_v24 = vld [vmem:[%s4400_s3 + $0x90] sm:$0xff] }
 0xff6   :  { %3478 = vmatprep.subr.mxu1 %v2487_v50  ;;  %3480 = vmatprep.mubr.msk.f32.mxu1 %vm126_vm1, %v2471_v20 }
 0xff7   :  { %3479 = vmatpush3.msra.mxu1 %v2487_v50  ;;  %v2464_v14 = vpop.permute.xlu1 %2463 }
 0xff8   :  { %v2472_v29 = vsel %vm1075_vm3, %v2470_v22, %v2464_v14  ;;  %3494 = vmatprep.subr.mxu1 %v3120_v25 }
 0xff9   :  { %3481 = vmatmul.mubr.msk.f32.vlgmr.msra.gmra.mxu1 %vm126_vm1, %v2472_v29 }
 0xffa   :  { %3495 = vmatpush3.msra.mxu1 %v3120_v25 }
 0xffb   :  { %3496 = vmatprep.subr.mxu1 %v3119_v16 }
 0xffc   :  { %3497 = vmatpush3.msra.mxu1 %v3119_v16 }
 0xffd   :  { %3498 = vmatprep.subr.mxu1 %v3118_v17 }
 0xffe   :  { %3499 = vmatpush3.msra.mxu1 %v3118_v17 }
 0xfff   :  { %3500 = vmatprep.subr.mxu1 %v3117_v18 }
0x1000   :  { %3501 = vmatpush3.msra.mxu1 %v3117_v18 }
0x1001   :  { %3502 = vmatprep.subr.mxu1 %v3116_v46 }
0x1002   :  { %3503 = vmatpush3.msra.mxu1 %v3116_v46 }
0x1003   :  { %3504 = vmatprep.subr.mxu1 %v3115_v44 }
0x1004   :  { %3505 = vmatpush3.msra.mxu1 %v3115_v44 }
0x1005   :  { %3506 = vmatprep.subr.mxu1 %v3114_v19 }
0x1006   :  { %3507 = vmatpush3.msra.mxu1 %v3114_v19 }
0x1007   :  { %3508 = vmatprep.subr.mxu1 %v3113_v12 }
0x1008   :  { %3509 = vmatpush3.msra.mxu1 %v3113_v12 }
0x1009   :  { %3510 = vmatprep.subr.mxu1 %v3112_v43 }
0x100a   :  { %3511 = vmatpush3.msra.mxu1 %v3112_v43 }
0x100b   :  { %3512 = vmatprep.subr.mxu1 %v3111_v45 }
0x100c   :  { %3513 = vmatpush3.msra.mxu1 %v3111_v45 }
0x100d   :  { %3514 = vmatprep.subr.mxu1 %v3110_v47 }
0x100e   :  { %3515 = vmatpush3.msra.mxu1 %v3110_v47 }
0x100f   :  { %3516 = vmatprep.subr.mxu1 %v3109_v23 }
0x1010   :  { %3517 = vmatpush3.msra.mxu1 %v3109_v23 }
0x1011   :  { %3518 = vmatprep.subr.mxu1 %v3108_v4 }
0x1012   :  { %3519 = vmatpush3.msra.mxu1 %v3108_v4 }
0x1013   :  { %3520 = vmatprep.subr.mxu1 %v3107_v24 }
0x1014   :  { %3521 = vmatpush3.msra.mxu1 %v3107_v24 }
0x1015   :  { %3522 = vmatprep.subr.mxu1 %v3106_v27 }
0x1016   :  { %3523 = vmatpush3.msra.mxu1 %v3106_v27 }
0x1017   :  { %3524 = vmatprep.subr.mxu1 %v3105_v5 }
0x1018   :  { %3525 = vmatpush3.msra.mxu1 %v3105_v5 }
0x10b9   :  { %v3482_v31 = vpop.f32.mrf.mxu1 }
0x10ba   :  { %v2576_v6 = vadd.f32 %v3482_v31, %v3090_v30 }
0x10bb   :  { %v2570_v33 = vpop.f32.mrf.mxu1 }
0x10bc   :  { %v2580_v36 = vadd.f32 %v2576_v6, %v4090_v35  ;;  %v2571_v32 = vadd.f32 %v3090_v30, %v2570_v33 }
0x10be   :  { %v2579_v37 = vadd.f32 %v2571_v32, %v4088_v34  ;;  %v2586_v38 = vsel %vm126_vm1, %v2580_v36, 0.0  ;;  %v3100_v34 = vld [vmem:[%s4399_s2 + $0x78] sm:$0xff] }
0x10bf   :  { %2587 = vadd.xlane.f32.xlu1 %v2586_v38  ;;  %3483 = vmatprep.subr.mxu0 %v3100_v34 }
0x10c0   :  { %v2583_v39 = vsel %vm126_vm1, %v2579_v37, 0.0  ;;  %3484 = vmatpush3.msra.mxu0 %v3100_v34 }
0x10c1   :  { %2584 = vadd.xlane.f32.xlu0 %v2583_v39  ;;  %3485 = vmatprep.subr.mxu0 %v3099_v42 }
0x10c2   :  { %3486 = vmatpush3.msra.mxu0 %v3099_v42 }
0x10c3   :  { %3487 = vmatprep.subr.mxu0 %v3098_v57 }
0x10c4   :  { %3488 = vmatpush3.msra.mxu0 %v3098_v57 }
0x10c5   :  { %3489 = vmatprep.subr.mxu0 %v3097_v58 }
0x10c6   :  { %3490 = vmatpush3.msra.mxu0 %v3097_v58 }
0x1148   :  { %v2588_v40 = vpop.xlane.xlu1 %2587 }
0x1149   :  { %v2590_v41 = vmul.f32 0.03125, %v2588_v40 }
0x114a   :  { %v2585_v48 = vpop.xlane.xlu0 %2584 }
0x114b   :  { %v2589_v51 = vmul.f32 0.03125, %v2585_v48  ;;  %v2592_v52 = vsub.f32 %v2580_v36, %v2590_v41 }
0x114d   :  { %v2591_v54 = vsub.f32 %v2579_v37, %v2589_v51  ;;  %v2594_v56 = vmul.f32 %v2592_v52, %v2592_v52 }
0x114f   :  { %v2593_v53 = vmul.f32 %v2591_v54, %v2591_v54  ;;  %v2598_v35 = vsel %vm126_vm1, %v2594_v56, 0.0 }
0x1151   :  { %v2595_v55 = vsel %vm126_vm1, %v2593_v53, 0.0 }
0x1152   :  { %2596 = vadd.xlane.f32.xlu0 %v2595_v55 }
0x1156   :  { %2599 = vadd.xlane.f32.xlu0 %v2598_v35 }
0x11db   :  { %v2597_v59 = vpop.xlane.xlu0 %2596 }
0x11dc   :  { %v2601_v60 = vmul.f32 0.03125, %v2597_v59 }
0x11de   :  { %v2603_v61 = vadd.f32 1e-12, %v2601_v60 }
0x11df   :  { %v2600_v62 = vpop.xlane.xlu0 %2599 }
0x11e0   :  { %3633 = vrsqrt.f32 %v2603_v61  ;;  %v2602_v63 = vmul.f32 0.03125, %v2600_v62 }
0x11e2   :  { %v2604_v0 = vadd.f32 1e-12, %v2602_v63 }
0x11e4   :  { %3635 = vrsqrt.f32 %v2604_v0 }
0x11ed   :  { %v3634_v2 = vpop.eup %3633 }
0x11ee   :  { %v2607_v7 = vmul.f32 %v3634_v2, %v2591_v54 }
0x11f0   :  { %v2613_v9 = vmul.f32 %v3095_v3, %v2607_v7 }
0x11f1   :  { %v3636_v8 = vpop.eup %3635 }
0x11f2   :  { %v2608_v1 = vmul.f32 %v3636_v8, %v2592_v52  ;;  %v4302_v10 = vadd.f32 %v3096_v26, %v2613_v9 }
0x11f4   :  { %v2614_v11 = vmul.f32 %v3095_v3, %v2608_v1  ;;  %3491 = vmatprep.mubr.msk.f32.mxu0 %vm126_vm1, %v4302_v10 }
0x11f6   :  { %v4306_v13 = vadd.f32 %v3096_v26, %v2614_v11 }
0x11f8   :  { %3492 = vmatmul.mubr.msk.f32.vlgmr.msra.gmra.mxu0 %vm126_vm1, %v4306_v13 }
0x12b8   :  { %v3493_v15 = vpop.f32.mrf.mxu0 }
0x12b9   :  { %v2708_v50 = vadd.f32 %v3493_v15, %v3102_v28 }
0x12ba   :  { %v2702_v20 = vpop.f32.mrf.mxu0 }
0x12bb   :  { %v2714_v21 = vmul.f32 0.70710677, %v2708_v50  ;;  %v2703_v22 = vadd.f32 %v3102_v28, %v2702_v20  ;;  %v2712_v24 = vmul.f32 0.5, %v2708_v50  ;;  %v3122_v28 = vld [vmem:[%s4401_s4 + $0xd] ss:$0 sm:$0xff] }
0x12bd   :  { %v2720_v14 = vand.u32 2147483647, %v2714_v21  ;;  %v2713_v29 = vmul.f32 0.70710677, %v2703_v22  ;;  %vm2716_vm6 = vcmp.ge.f32.partialorder %v2714_v21, 0.0  ;;  %v2711_v23 = vmul.f32 0.5, %v2703_v22 }
0x12be   :  { %v2718_v46 = vsel %vm2716_vm6, 1.0, %v3684_v49 }
0x12bf   :  { %v2722_v30 = vmul.f32 0.3275911, %v2720_v14  ;;  %v2719_v31 = vand.u32 2147483647, %v2713_v29  ;;  %v2752_v32 = vsub.f32 0.0, %v2720_v14  ;;  %vm2715_vm7 = vcmp.ge.f32.partialorder %v2713_v29, 0.0 }
0x12c0   :  { %v2717_v43 = vsel %vm2715_vm7, 1.0, %v3684_v49 }
0x12c1   :  { %v2724_v6 = vadd.f32 1.0, %v2722_v30  ;;  %v2721_v33 = vmul.f32 0.3275911, %v2719_v31  ;;  %v2751_v39 = vsub.f32 0.0, %v2719_v31  ;;  %v2754_v48 = vmul.f32 %v2752_v32, %v2720_v14 }
0x12c3   :  { %3637 = vrcp.f32 %v2724_v6  ;;  %v2723_v36 = vadd.f32 1.0, %v2721_v33  ;;  %v2753_v53 = vmul.f32 %v2751_v39, %v2719_v31  ;;  %v2757_v56 = vmul.f32 1.442695, %v2754_v48  ;;  %v2914_v48 = vld [vmem:[%s4398_s1 + $0x18] sm:$0xff] }
0x12c5   :  { %3639 = vrcp.f32 %v2723_v36  ;;  %v2755_v42 = vmul.f32 1.442695, %v2753_v53 }
0x12c6   :  { %3641 = vpow2.f32 %v2757_v56 }
0x12c7   :  { %3643 = vpow2.f32 %v2755_v42  ;;  %v3125_v42 = vld [vmem:[%s4401_s4 + $0xe] ss:$0 sm:$0xff] }
0x12d0   :  { %v3638_v37 = vpop.eup %3637 }
0x12d1   :  { %v2728_v38 = vmul.f32 %v3638_v37, %v2724_v6 }
0x12d2   :  { %v3640_v40 = vpop.eup %3639 }
0x12d3   :  { %v2730_v41 = vsub.f32 2.0, %v2728_v38  ;;  %v2727_v51 = vmul.f32 %v3640_v40, %v2723_v36  ;;  %v3642_v1 = vpop.eup %3641 }
0x12d4   :  { %v3644_v17 = vpop.eup %3643 }
0x12d5   :  { %v2732_v52 = vmul.f32 %v3638_v37, %v2730_v41  ;;  %v2729_v54 = vsub.f32 2.0, %v2727_v51  ;;  %v2915_v41 = vld [vmem:[%s4398_s1 + $0x20] sm:$0xff]  ;;  %v2913_v51 = vld [vmem:[%s4398_s1 + $0x10] sm:$0xff] }
0x12d7   :  { %v2734_v55 = vmul.f32 1.0614054, %v2732_v52  ;;  %v2731_v35 = vmul.f32 %v3640_v40, %v2729_v54  ;;  %v3685_v40 = vmov 0.0  }
0x12d8   :  { %3529 = vmatprep.subr.mxu0 %v3685_v40  ;;  %3537 = vmatprep.mubr.msk.f32.mxu0 %vm3686_vm8, %v3685_v40 }
0x12d9   :  { %v2736_v34 = vadd.f32 -1.4531521, %v2734_v55  ;;  %v2733_v57 = vmul.f32 1.0614054, %v2731_v35 }
0x12db   :  { %v2738_v58 = vmul.f32 %v2736_v34, %v2732_v52  ;;  %v2735_v59 = vadd.f32 -1.4531521, %v2733_v57 }
0x12dd   :  { %v2740_v60 = vadd.f32 1.4214138, %v2738_v58  ;;  %v2737_v61 = vmul.f32 %v2735_v59, %v2731_v35  ;;  %v3126_v59 = vld [vmem:[%s4401_s4 + $0xf] ss:$0 sm:$0xff]  ;;  %s3004_s4 = sshll.u32 %s3687_s27, 4  ;;  %s3005_s4 = int_to_ptr.vmem [resolvable:$true] %s3004_s4 }
0x12de   :  { %s3653_s28 = scalar_lea.vmem %s3005_s4, 32  ;;  %p3658_p1 = scmp.lt.s32.totalorder %s3005_s4, %s3005_s4 }
0x12df   :  { %v2742_v62 = vmul.f32 %v2740_v60, %v2732_v52  ;;  %v2739_v63 = vadd.f32 1.4214138, %v2737_v61  ;;  %p3654_p0 = scmp.ne.s32.totalorder %s3005_s4, %s3653_s28  ;;  %p3659_p2 = scmp.lt.s32.totalorder %s3653_s28, %s3653_s28 }
0x12e1   :  { %v2744_v0 = vadd.f32 -0.28449672, %v2742_v62  ;;  %v2741_v2 = vmul.f32 %v2739_v63, %v2731_v35  ;;  %p3660_p3 = por %p3659_p2, %p3658_p1 }
0x12e3   :  { %v2746_v3 = vmul.f32 %v2744_v0, %v2732_v52  ;;  %v2743_v7 = vadd.f32 -0.28449672, %v2741_v2  ;;  %p3661_p4 = pnand %p3660_p3, %p3654_p0 }
0x12e5   :  { %v2748_v26 = vadd.f32 0.2548296, %v2746_v3  ;;  %v2745_v9 = vmul.f32 %v2743_v7, %v2731_v35  ;;  %v3127_v7 = vld [vmem:[%s4398_s1 + $0x39] ss:$0 sm:$0xff] }
0x12e7   :  { %v2750_v8 = vmul.f32 %v2748_v26, %v2732_v52  ;;  %v2747_v11 = vadd.f32 0.2548296, %v2745_v9 }
0x12e9   :  { %v2760_v25 = vmul.f32 %v3642_v1, %v2750_v8  ;;  %v2749_v16 = vmul.f32 %v2747_v11, %v2731_v35 }
0x12eb   :  { %v2762_v18 = vsub.f32 1.0, %v2760_v25  ;;  %v2759_v44 = vmul.f32 %v3644_v17, %v2749_v16 }
0x12ed   :  { %v2764_v19 = vmul.f32 %v2762_v18, %v2718_v46  ;;  %v2761_v12 = vsub.f32 1.0, %v2759_v44 }
0x12ef   :  { %v2763_v45 = vmul.f32 %v2761_v12, %v2717_v43  ;;  %v2766_v47 = vadd.f32 1.0, %v2764_v19 }
0x12f1   :  { %v2765_v4 = vadd.f32 1.0, %v2763_v45  ;;  %v2768_v5 = vmul.f32 %v2766_v47, %v2712_v24 }
0x12f3   :  { %v2767_v27 = vmul.f32 %v2765_v4, %v2711_v23 }
0x12f5   :  { %3526 = vmatprep.mubr.f32.mxu1 %v2767_v27 }
0x12f6   :  { %3527 = vmatmul.mubr.f32.vlgmr.msra.gmra.mxu1 %v2768_v5 }
0x13b6   :  { %v3528_v15 = vpop.f32.mrf.mxu1 }
0x13b7   :  { %v2863_v20 = vadd.f32 %v3528_v15, %v3122_v28 }
0x13b8   :  { %v2857_v21 = vpop.f32.mrf.mxu1 }
0x13b9   :  { %v2867_v14 = vadd.f32 %v2863_v20, %v4306_v13  ;;  %v2858_v29 = vadd.f32 %v3122_v28, %v2857_v21 }
0x13bb   :  { %v2866_v49 = vadd.f32 %v2858_v29, %v4302_v10  ;;  %v2873_v22 = vsel %vm126_vm1, %v2867_v14, 0.0  ;;  %v2916_v10 = vld [vmem:[%s4398_s1 + $0x28] sm:$0xff] }
0x13bc   :  { %2874 = vadd.xlane.f32.xlu1 %v2873_v22  ;;  %3530 = vmatpush3.msra.mxu0 %v2916_v10 }
0x13bd   :  { %v2870_v50 = vsel %vm126_vm1, %v2866_v49, 0.0  ;;  %3531 = vmatprep.subr.mxu0 %v3685_v40 }
0x13be   :  { %2871 = vadd.xlane.f32.xlu0 %v2870_v50  ;;  %3532 = vmatpush3.msra.mxu0 %v2915_v41 }
0x13bf   :  { %3533 = vmatprep.subr.mxu0 %v3685_v40 }
0x13c0   :  { %3534 = vmatpush3.msra.mxu0 %v2914_v48 }
0x13c1   :  { %3535 = vmatprep.subr.mxu0 %v3685_v40 }
0x13c2   :  { %3536 = vmatpush3.msra.mxu0 %v2913_v51 }
0x1445   :  { %v2875_v30 = vpop.xlane.xlu1 %2874 }
0x1446   :  { %v2877_v31 = vmul.f32 0.03125, %v2875_v30 }
0x1447   :  { %v2872_v6 = vpop.xlane.xlu0 %2871 }
0x1448   :  { %v2879_v33 = vsub.f32 %v2867_v14, %v2877_v31  ;;  %v2876_v36 = vmul.f32 0.03125, %v2872_v6 }
0x144a   :  { %v2878_v32 = vsub.f32 %v2866_v49, %v2876_v36  ;;  %v2881_v37 = vmul.f32 %v2879_v33, %v2879_v33 }
0x144c   :  { %v2885_v38 = vsel %vm126_vm1, %v2881_v37, 0.0  ;;  %v2880_v39 = vmul.f32 %v2878_v32, %v2878_v32 }
0x144d   :  { %2886 = vadd.xlane.f32.xlu1 %v2885_v38 }
0x144e   :  { %v2882_v13 = vsel %vm126_vm1, %v2880_v39, 0.0 }
0x144f   :  { %2883 = vadd.xlane.f32.xlu0 %v2882_v13 }
0x14d6   :  { %v2887_v52 = vpop.xlane.xlu1 %2886 }
0x14d7   :  { %v2889_v54 = vmul.f32 0.03125, %v2887_v52 }
0x14d8   :  { %v2884_v53 = vpop.xlane.xlu0 %2883 }
0x14d9   :  { %v2891_v55 = vadd.f32 1e-12, %v2889_v54  ;;  %v2888_v56 = vmul.f32 0.03125, %v2884_v53 }
0x14db   :  { %3645 = vrsqrt.f32 %v2891_v55  ;;  %v2890_v35 = vadd.f32 1e-12, %v2888_v56 }
0x14dd   :  { %3647 = vrsqrt.f32 %v2890_v35 }
0x14e8   :  { %v3646_v34 = vpop.eup %3645 }
0x14e9   :  { %v2895_v57 = vmul.f32 %v3646_v34, %v2879_v33 }
0x14ea   :  { %v3648_v58 = vpop.eup %3647 }
0x14eb   :  { %v2894_v60 = vmul.f32 %v3648_v58, %v2878_v32  ;;  %v2901_v61 = vmul.f32 %v3125_v42, %v2895_v57 }
0x14ed   :  { %v2900_v62 = vmul.f32 %v3125_v42, %v2894_v60  ;;  %v2907_v63 = vadd.f32 %v3126_v59, %v2901_v61 }
0x14ef   :  { %v2906_v0 = vadd.f32 %v3126_v59, %v2900_v62  ;;  %v2909_v2 = vrot.slane %v2907_v63, 7 }
0x14f1   :  { %v2912_v3 = vsel %vm2911_vm9, %v2906_v0, %v2909_v2 }
0x14f2   :  { %3538 = vmatmul.mubr.msk.f32.vlgmr.msra.gmra.mxu0 %vm126_vm1, %v2912_v3 }
0x15b2   :  { %v2991_v26 = vpop.f32.mrf.mxu0 }
0x15b3   :  { %v2992_v9 = vadd.f32 %v3127_v7, %v2991_v26 }
0x15b4   :  { %v3539_v8 = vpop.f32.mrf.mxu0 }
0x15b5   :  { %3649 = vtanh.f32 %v2992_v9 }
0x15c2   :  { %v3650_v1 = vpop.eup %3649 }
0x15c3   :  { %2997 = vst.msk [vmem:[#allocation2] sm:$0x3] %vm2996_vm10, %v3650_v1 }
0x15c4   :  { %3664 = shalt.err (!%p3661_p4)
}
0x15c5   :  { %3007 = dma.vmem_to_hbm [thread:$0]  %s3005_s4, 32, %s4402_s5, [#allocation3]  }
0x15c6   :  { %3673 = dma.done.wait [#allocation3], 32  }
0x15c7   :  { %3674 = vsyncadd [#allocation3], 4294967264 }
0x15c8   :  { %3011 = vsyncpa [#allocation3], 1 }

</bundles_post_ra>
